<compile_context>
chip_gen: v7x
topology: tpu7x:2x2x1
jax: 0.10.0
libtpu: 0.0.40
codegen_flags: <defaults>
</compile_context>

<pallas_src>
import functools

import jax
import jax.numpy as jnp
from jax import lax
from jax.experimental import pallas as pl
from jax.experimental.pallas import tpu as pltpu


def _layernorm(x, gamma, beta, eps=1e-5):
    # One-pass mean/variance (sum + sum-of-squares): one pair of cross-lane
    # reductions per row.  Biased variance, matches nn.LayerNorm.
    # NOTE: one-pass variance can lose precision when |mean| >> std
    # (catastrophic cancellation); acceptable at bf16-matmul tolerances.
    inv_n = 1.0 / x.shape[-1]
    mean = jnp.sum(x, axis=-1, keepdims=True) * inv_n
    var = jnp.maximum(
        jnp.sum(x * x, axis=-1, keepdims=True) * inv_n - mean * mean, 0.0)
    return (x - mean) * lax.rsqrt(var + eps) * gamma + beta


# --------------------------------------------------------------------------- #
# Kernel 1: K / V projections, once per token, head-major bf16 output.
# --------------------------------------------------------------------------- #
def _kv_proj_kernel(x_ref, wk_ref, bk_ref, wv_ref, bv_ref, k_ref, v_ref,
                    *, num_heads, head_dim):
    # x_ref: (ts, E) f32 rows of one batch; k_ref / v_ref: (H, ts, hd) bf16.
    x_bf = x_ref[...].astype(jnp.bfloat16)
    k = jnp.dot(x_bf, wk_ref[...], preferred_element_type=jnp.float32) + bk_ref[...]
    v = jnp.dot(x_bf, wv_ref[...], preferred_element_type=jnp.float32) + bv_ref[...]
    # Head-major relayout happens ONCE per row tile here (never again per KV
    # step in the attention kernel).
    for h in range(num_heads):
        sl = slice(h * head_dim, (h + 1) * head_dim)
        k_ref[h] = k[:, sl].astype(jnp.bfloat16)
        v_ref[h] = v[:, sl].astype(jnp.bfloat16)


# --------------------------------------------------------------------------- #
# Kernel 2: flash-style attention + out-proj + LN1 + MLP + LN2.
# Grid: (batch, q_tile, kv_chunk); kv_chunk is the innermost reduction axis.
# --------------------------------------------------------------------------- #
def _attn_mlp_kernel(
    x_ref, k_ref, v_ref,
    wq_ref, bq_ref, wo_ref, bo_ref,
    g1_ref, be1_ref,
    w1_ref, b1_ref, w2_ref, b2_ref,
    g2_ref, be2_ref,
    o_ref,
    q_scr, m_scr, l_scr, acc_scr,
    *, num_heads, head_dim, scale, batched_heads,
):
    kv = pl.program_id(2)
    n_kv = pl.num_programs(2)
    bf16 = jnp.bfloat16

    # ---- once per (batch, q-tile): Q projection into persistent scratch and
    #      online-softmax state init -----------------------------------------
    @pl.when(kv == 0)
    def _init():
        x_bf = x_ref[...].astype(bf16)
        q = jnp.dot(x_bf, wq_ref[...], preferred_element_type=jnp.float32)
        q = (q + bq_ref[...]) * scale          # fold softmax scale into Q (f32)
        for h in range(num_heads):             # head-major, once per tile
            q_scr[h] = q[:, h * head_dim:(h + 1) * head_dim].astype(bf16)
        m_scr[...] = jnp.full(m_scr.shape, -jnp.inf, jnp.float32)
        l_scr[...] = jnp.zeros(l_scr.shape, jnp.float32)
        acc_scr[...] = jnp.zeros(acc_scr.shape, jnp.float32)

    # ---- every KV chunk: online softmax update ------------------------------
    if batched_heads:
        # head_dim is a multiple of 64: one batched contraction per stage.
        qh = q_scr[...]                        # (H, tq, hd) bf16
        kh = k_ref[...]                        # (H, tkv, hd) bf16
        vh = v_ref[...]
        s = jnp.einsum("hqd,hkd->hqk", qh, kh,
                       preferred_element_type=jnp.float32)          # (H, tq, tkv)
        m_prev = m_scr[...]
        m_new = jnp.maximum(m_prev, jnp.max(s, axis=-1, keepdims=True))
        alpha = jnp.exp(m_prev - m_new)
        p = jnp.exp(s - m_new)
        l_scr[...] = alpha * l_scr[...] + jnp.sum(p, axis=-1, keepdims=True)
        acc_scr[...] = alpha * acc_scr[...] + jnp.einsum(
            "hqk,hkd->hqd", p.astype(bf16), vh,
            preferred_element_type=jnp.float32)
        m_scr[...] = m_new
    else:
        # Toy / unaligned head dims: statically unrolled per-head loop.  Heads
        # are the leading axis of q_scr / k_ref / v_ref, so no masked lane
        # slices are needed here.
        for h in range(num_heads):
            s = jnp.einsum("qd,kd->qk", q_scr[h], k_ref[h],
                           preferred_element_type=jnp.float32)      # (tq, tkv)
            m_prev = m_scr[h]
            m_new = jnp.maximum(m_prev, jnp.max(s, axis=-1, keepdims=True))
            alpha = jnp.exp(m_prev - m_new)
            p = jnp.exp(s - m_new)
            l_scr[h] = alpha * l_scr[h] + jnp.sum(p, axis=-1, keepdims=True)
            acc_scr[h] = alpha * acc_scr[h] + jnp.dot(
                p.astype(bf16), v_ref[h], preferred_element_type=jnp.float32)
            m_scr[h] = m_new

    # ---- last KV chunk: out-proj + residual/LN + MLP + residual/LN ----------
    @pl.when(kv == n_kv - 1)
    def _finalize():
        # Approx reciprocal on the EUP: fine for inference; do not reuse for
        # a training backward pass.
        inv_l = pl.reciprocal(l_scr[...], approx=True)               # (H, tq, 1)
        ctx = acc_scr[...] * inv_l                                   # (H, tq, hd) f32
        attn = jnp.concatenate([ctx[h] for h in range(num_heads)], axis=-1)
        attn = jnp.dot(attn.astype(bf16), wo_ref[...],
                       preferred_element_type=jnp.float32) + bo_ref[...]
        x1 = _layernorm(x_ref[...].astype(jnp.float32) + attn,
                        g1_ref[...], be1_ref[...])
        # TODO(synk): tile the MLP hidden dim for very large mlp_dim so w1/w2
        #             need not be fully resident in VMEM (large models on v7x).
        h1 = jnp.maximum(
            jnp.dot(x1.astype(bf16), w1_ref[...],
                    preferred_element_type=jnp.float32) + b1_ref[...], 0.0)
        mlp = jnp.dot(h1.astype(bf16), w2_ref[...],
                      preferred_element_type=jnp.float32) + b2_ref[...]
        x2 = _layernorm(x1 + mlp, g2_ref[...], be2_ref[...])
        o_ref[...] = x2.astype(o_ref.dtype)


# --------------------------------------------------------------------------- #
# Host-side wrappers.
# --------------------------------------------------------------------------- #
def _pick_tile(n, candidates):
    for t in candidates:
        if n % t == 0:
            return t
    return n


def _vmem_capacity_bytes():
    try:
        return int(pltpu.get_tpu_info().vmem_capacity_bytes)
    except Exception:
        return 64 * 1024 * 1024          # conservative (v7x-sized) fallback


def _const_spec(shape, idx_arity, single_buffer):
    # Whole-array block with a constant index -> fetched once, not per step.
    zeros = (0,) * len(shape)
    if idx_arity == 2:
        idx = lambda b, i, _z=zeros: _z
    else:
        idx = lambda b, i, j, _z=zeros: _z
    if single_buffer:
        # Constant-index blocks never change: single-buffer them so large
        # weights are resident once instead of twice (key on v7x's 64 MiB).
        return pl.BlockSpec(shape, idx, pipeline_mode=pl.Buffered(1))
    return pl.BlockSpec(shape, idx)


def _kv_proj(x, wk, bk, wv, bv, *, num_heads, head_dim, s_tile, single_buffer,
             vmem_limit):
    B, S, E = x.shape
    ns = S // s_tile
    kernel = functools.partial(_kv_proj_kernel,
                               num_heads=num_heads, head_dim=head_dim)
    weight_bytes = 2 * (2 * E * E) + 4 * (2 * E)
    cost = pl.CostEstimate(
        flops=int(4 * B * S * E * E),
        transcendentals=0,
        bytes_accessed=int(4 * B * S * E + 4 * B * S * E + weight_bytes))
    out_sdt = jax.ShapeDtypeStruct((B, num_heads, S, head_dim), jnp.bfloat16)
    return pl.pallas_call(
        kernel,
        out_shape=(out_sdt, out_sdt),
        grid_spec=pltpu.PrefetchScalarGridSpec(
            num_scalar_prefetch=0,
            grid=(B, ns),
            in_specs=[
                pl.BlockSpec((None, s_tile, E), lambda b, si: (b, si, 0)),
                _const_spec((E, E), 2, single_buffer),       # wk
                _const_spec((1, E), 2, single_buffer),       # bk
                _const_spec((E, E), 2, single_buffer),       # wv
                _const_spec((1, E), 2, single_buffer),       # bv
            ],
            out_specs=[
                pl.BlockSpec((None, num_heads, s_tile, head_dim),
                             lambda b, si: (b, 0, si, 0)),
                pl.BlockSpec((None, num_heads, s_tile, head_dim),
                             lambda b, si: (b, 0, si, 0)),
            ]),
        compiler_params=pltpu.CompilerParams(
            dimension_semantics=("parallel", "parallel"),
            vmem_limit_bytes=vmem_limit),
        cost_estimate=cost,
    )(x, wk, bk, wv, bv)


def _transformer_block(x, params, *, num_heads, q_tile, kv_tile, s_tile,
                       single_buffer):
    B, S, E = x.shape
    assert E % num_heads == 0, "embed_dim must be divisible by num_heads"
    head_dim = E // num_heads
    mlp_dim = params["w1"].shape[1]
    scale = float(head_dim) ** -0.5

    # Generation-aware VMEM budget: ~85% of physical leaves headroom for
    # compiler-internal scratch (~54 MiB on v7x, ~109 MiB on v5e/v6e).
    phys_vmem = _vmem_capacity_bytes()
    vmem_limit = int(phys_vmem * 0.85)
    big_vmem = phys_vmem >= (96 << 20)

    q_cands = (512, 256, 128) if big_vmem else (256, 128, 512)
    tq = _pick_tile(S, q_cands) if q_tile is None else q_tile
    tkv = _pick_tile(S, (512, 256, 128)) if kv_tile is None else kv_tile
    ts = _pick_tile(S, (512, 256, 128)) if s_tile is None else s_tile
    assert S % tq == 0 and S % tkv == 0 and S % ts == 0
    nq, nkv = S // tq, S // tkv

    bf16 = jnp.bfloat16
    wq, wk, wv, wo = (params[name].astype(bf16)
                      for name in ("wq", "wk", "wv", "wo"))
    w1, w2 = params["w1"].astype(bf16), params["w2"].astype(bf16)

    # 1) K / V projected once per token (not per query tile), head-major bf16.
    k, v = _kv_proj(x, wk, params["bk"], wv, params["bv"],
                    num_heads=num_heads, head_dim=head_dim, s_tile=ts,
                    single_buffer=single_buffer, vmem_limit=vmem_limit)

    # 2) flash-style attention + out-proj + LN + MLP + LN.
    kernel = functools.partial(
        _attn_mlp_kernel, num_heads=num_heads, head_dim=head_dim, scale=scale,
        batched_heads=(head_dim % 64 == 0))

    in_specs = [
        pl.BlockSpec((None, tq, E), lambda b, qi, ki: (b, qi, 0)),        # x rows
        pl.BlockSpec((None, num_heads, tkv, head_dim),
                     lambda b, qi, ki: (b, 0, ki, 0)),                    # K chunk
        pl.BlockSpec((None, num_heads, tkv, head_dim),
                     lambda b, qi, ki: (b, 0, ki, 0)),                    # V chunk
        _const_spec((E, E), 3, single_buffer),                            # wq
        _const_spec((1, E), 3, single_buffer),                            # bq
        _const_spec((E, E), 3, single_buffer),                            # wo
        _const_spec((1, E), 3, single_buffer),                            # bo
        _const_spec((1, E), 3, single_buffer),                            # gamma1
        _const_spec((1, E), 3, single_buffer),                            # beta1
        _const_spec((E, mlp_dim), 3, single_buffer),                      # w1
        _const_spec((1, mlp_dim), 3, single_buffer),                      # b1
        _const_spec((mlp_dim, E), 3, single_buffer),                      # w2
        _const_spec((1, E), 3, single_buffer),                            # b2
        _const_spec((1, E), 3, single_buffer),                            # gamma2
        _const_spec((1, E), 3, single_buffer),                            # beta2
    ]

    weight_bytes = 2 * (2 * E * E + 2 * E * mlp_dim) + 4 * (6 * E + mlp_dim)
    flops = int(4 * B * S * E * E            # Q proj + out proj
                + 4 * B * S * E * mlp_dim    # MLP
                + 4 * B * S * S * E)         # QK^T + PV
    cost = pl.CostEstimate(
        flops=flops,
        transcendentals=int(B * num_heads * S * S),
        bytes_accessed=int(8 * B * S * E             # x read + out write (f32)
                           + nq * 4 * B * S * E      # K/V bf16 re-streamed per q tile
                           + weight_bytes))

    return pl.pallas_call(
        kernel,
        out_shape=jax.ShapeDtypeStruct((B, S, E), x.dtype),
        grid_spec=pltpu.PrefetchScalarGridSpec(
            num_scalar_prefetch=0,
            grid=(B, nq, nkv),
            in_specs=in_specs,
            out_specs=pl.BlockSpec((None, tq, E), lambda b, qi, ki: (b, qi, 0)),
            scratch_shapes=[
                pltpu.VMEM((num_heads, tq, head_dim), bf16),        # scaled Q
                pltpu.VMEM((num_heads, tq, 1), jnp.float32),        # running max
                pltpu.VMEM((num_heads, tq, 1), jnp.float32),        # running denom
                pltpu.VMEM((num_heads, tq, head_dim), jnp.float32), # running numer
            ]),
        compiler_params=pltpu.CompilerParams(
            # b / qi are independent (megacore / both v7x TCs); kv carries the
            # online-softmax scratch so it must stay "arbitrary".
            dimension_semantics=("parallel", "parallel", "arbitrary"),
            vmem_limit_bytes=vmem_limit),
        cost_estimate=cost,
    )(
        x, k, v,
        wq, params["bq"], wo, params["bo"],
        params["gamma1"], params["beta1"],
        w1, params["b1"], w2, params["b2"],
        params["gamma2"], params["beta2"],
    )


def transformer_block(x, params, *, num_heads, q_tile=None, kv_tile=None,
                      s_tile=None):
    kwargs = dict(num_heads=num_heads, q_tile=q_tile, kv_tile=kv_tile,
                  s_tile=s_tile)
    try:
        return _transformer_block(x, params, single_buffer=True, **kwargs)
    except Exception:
        # Fallback for jax versions where pipeline_mode=pl.Buffered(1)
        # (single-buffered constant weight blocks) is not supported by the TPU
        # grid pipeline; rebuild with default double buffering.
        return _transformer_block(x, params, single_buffer=False, **kwargs)


# --------------------------------------------------------------------------- #
# Parameters / reference / test.
# --------------------------------------------------------------------------- #
def _init_params(key, embed_dim, mlp_dim):
    keys = jax.random.split(key, 12)
    s_e = 1.0 / jnp.sqrt(embed_dim)
    s_m = 1.0 / jnp.sqrt(mlp_dim)
    # Linear weights stored as (in, out) (i.e. PyTorch W.T).
    return {
        "wq": jax.random.uniform(keys[0], (embed_dim, embed_dim), jnp.float32, -s_e, s_e),
        "bq": jax.random.uniform(keys[1], (1, embed_dim), jnp.float32, -s_e, s_e),
        "wk": jax.random.uniform(keys[2], (embed_dim, embed_dim), jnp.float32, -s_e, s_e),
        "bk": jax.random.uniform(keys[3], (1, embed_dim), jnp.float32, -s_e, s_e),
        "wv": jax.random.uniform(keys[4], (embed_dim, embed_dim), jnp.float32, -s_e, s_e),
        "bv": jax.random.uniform(keys[5], (1, embed_dim), jnp.float32, -s_e, s_e),
        "wo": jax.random.uniform(keys[6], (embed_dim, embed_dim), jnp.float32, -s_e, s_e),
        "bo": jax.random.uniform(keys[7], (1, embed_dim), jnp.float32, -s_e, s_e),
        "gamma1": jnp.ones((1, embed_dim), jnp.float32),
        "beta1": jnp.zeros((1, embed_dim), jnp.float32),
        "w1": jax.random.uniform(keys[8], (embed_dim, mlp_dim), jnp.float32, -s_e, s_e),
        "b1": jax.random.uniform(keys[9], (1, mlp_dim), jnp.float32, -s_e, s_e),
        "w2": jax.random.uniform(keys[10], (mlp_dim, embed_dim), jnp.float32, -s_m, s_m),
        "b2": jax.random.uniform(keys[11], (1, embed_dim), jnp.float32, -s_m, s_m),
        "gamma2": jnp.ones((1, embed_dim), jnp.float32),
        "beta2": jnp.zeros((1, embed_dim), jnp.float32),
    }


def _reference(x, p, num_heads):
    # Pure-JAX f32 reference replicating the PyTorch forward (dropout = identity).
    B, S, E = x.shape
    hd = E // num_heads

    def ln(y, g, b, eps=1e-5):
        m = jnp.mean(y, -1, keepdims=True)
        v = jnp.mean((y - m) ** 2, -1, keepdims=True)
        return (y - m) / jnp.sqrt(v + eps) * g + b

    q = x @ p["wq"] + p["bq"]
    k = x @ p["wk"] + p["bk"]
    v = x @ p["wv"] + p["bv"]
    q = q.reshape(B, S, num_heads, hd).transpose(0, 2, 1, 3)
    k = k.reshape(B, S, num_heads, hd).transpose(0, 2, 1, 3)
    v = v.reshape(B, S, num_heads, hd).transpose(0, 2, 1, 3)
    sc = jnp.einsum("bhqd,bhkd->bhqk", q, k) * hd ** (-0.5)
    a = jax.nn.softmax(sc, axis=-1)
    ao = jnp.einsum("bhqk,bhkd->bhqd", a, v).transpose(0, 2, 1, 3).reshape(B, S, E)
    ao = ao @ p["wo"] + p["bo"]
    x1 = ln(x + ao, p["gamma1"], p["beta1"])
    mlp = jnp.maximum(x1 @ p["w1"] + p["b1"], 0.0) @ p["w2"] + p["b2"]
    return ln(x1 + mlp, p["gamma2"], p["beta2"])


if __name__ == "__main__":
    key = jax.random.PRNGKey(0)

    # Test 1: toy shapes (per-head fallback path, single KV chunk).
    B, S, E, H, M = 2, 8, 32, 4, 64
    k1, k2, key = jax.random.split(key, 3)
    x = jax.random.normal(k1, (B, S, E), jnp.float32)
    params = _init_params(k2, E, M)
    out = jax.block_until_ready(transformer_block(x, params, num_heads=H))
    ref = _reference(x, params, H)
    assert out.shape == (B, S, E)
    assert jnp.allclose(out, ref, atol=3e-2, rtol=3e-2), "mismatch (toy shapes)"

    # Test 2: head_dim=64 batched path, multi-chunk online softmax, q tiling.
    B, S, E, H, M = 2, 256, 128, 2, 256
    k1, k2 = jax.random.split(key)
    x = jax.random.normal(k1, (B, S, E), jnp.float32)
    params = _init_params(k2, E, M)
    out = jax.block_until_ready(
        transformer_block(x, params, num_heads=H,
                          q_tile=128, kv_tile=128, s_tile=128))
    ref = _reference(x, params, H)
    assert out.shape == (B, S, E)
    assert jnp.allclose(out, ref, atol=5e-2, rtol=5e-2), "mismatch (flash path)"

    print("KERNEL_OK")
</pallas_src>

<mosaic_0001>
module attributes {stable_mosaic.version = 11 : i64} {
  func.func @_kv_proj_kernel(%arg0: i32, %arg1: i32, %arg2: memref<1x8x32xf32, #tpu.memory_space<vmem>>, %arg3: memref<32x32xbf16, #tpu.memory_space<vmem>>, %arg4: memref<1x32xf32, #tpu.memory_space<vmem>>, %arg5: memref<32x32xbf16, #tpu.memory_space<vmem>>, %arg6: memref<1x32xf32, #tpu.memory_space<vmem>>, %arg7: memref<1x4x8x8xbf16, #tpu.memory_space<vmem>>, %arg8: memref<1x4x8x8xbf16, #tpu.memory_space<vmem>>) attributes {dimension_semantics = [#tpu.dimension_semantics<parallel>, #tpu.dimension_semantics<parallel>], iteration_bounds = array<i64: 2, 1>, scalar_prefetch = 0 : i64, scratch_operands = 0 : i64, tpu.core_type = #tpu.core_type<tc>, window_params = [{transform_indices = @transform_0, window_bounds = array<i64: 1, 8, 32>}, {pipeline_mode = #tpu.pipeline_mode<synchronous>, transform_indices = @transform_1, window_bounds = array<i64: 32, 32>}, {pipeline_mode = #tpu.pipeline_mode<synchronous>, transform_indices = @transform_2, window_bounds = array<i64: 1, 32>}, {pipeline_mode = #tpu.pipeline_mode<synchronous>, transform_indices = @transform_3, window_bounds = array<i64: 32, 32>}, {pipeline_mode = #tpu.pipeline_mode<synchronous>, transform_indices = @transform_4, window_bounds = array<i64: 1, 32>}, {transform_indices = @transform_5, window_bounds = array<i64: 1, 4, 8, 8>}, {transform_indices = @transform_6, window_bounds = array<i64: 1, 4, 8, 8>}]} {
    %c0 = arith.constant 0 : index
    %c0_0 = arith.constant 0 : index
    %c0_1 = arith.constant 0 : index
    %0 = vector.load %arg2[%c0, %c0_0, %c0_1] : memref<1x8x32xf32, #tpu.memory_space<vmem>>, vector<1x8x32xf32>
    %1 = vector.shape_cast %0 : vector<1x8x32xf32> to vector<8x32xf32>
    %2 = arith.truncf %1 : vector<8x32xf32> to vector<8x32xbf16>
    %c0_2 = arith.constant 0 : index
    %c0_3 = arith.constant 0 : index
    %3 = vector.load %arg3[%c0_2, %c0_3] : memref<32x32xbf16, #tpu.memory_space<vmem>>, vector<32x32xbf16>
    %cst = arith.constant dense<0.000000e+00> : vector<8x32xf32>
    %4 = tpu.matmul %2, %3, %cst {dimension_numbers = #tpu.dot_dimension_numbers<[1], [0], [0], [1], [0, 0, 1, 1], [], []>} : vector<8x32xbf16>, vector<32x32xbf16>, vector<8x32xf32> -> vector<8x32xf32>
    %c0_4 = arith.constant 0 : index
    %c0_5 = arith.constant 0 : index
    %5 = vector.load %arg4[%c0_4, %c0_5] : memref<1x32xf32, #tpu.memory_space<vmem>>, vector<1x32xf32>
    %6 = vector.broadcast %5 : vector<1x32xf32> to vector<8x32xf32>
    %7 = arith.addf %4, %6 : vector<8x32xf32>
    %c0_6 = arith.constant 0 : index
    %c0_7 = arith.constant 0 : index
    %8 = vector.load %arg5[%c0_6, %c0_7] : memref<32x32xbf16, #tpu.memory_space<vmem>>, vector<32x32xbf16>
    %cst_8 = arith.constant dense<0.000000e+00> : vector<8x32xf32>
    %9 = tpu.matmul %2, %8, %cst_8 {dimension_numbers = #tpu.dot_dimension_numbers<[1], [0], [0], [1], [0, 0, 1, 1], [], []>} : vector<8x32xbf16>, vector<32x32xbf16>, vector<8x32xf32> -> vector<8x32xf32>
    %c0_9 = arith.constant 0 : index
    %c0_10 = arith.constant 0 : index
    %10 = vector.load %arg6[%c0_9, %c0_10] : memref<1x32xf32, #tpu.memory_space<vmem>>, vector<1x32xf32>
    %11 = vector.broadcast %10 : vector<1x32xf32> to vector<8x32xf32>
    %12 = arith.addf %9, %11 : vector<8x32xf32>
    %13 = vector.extract_strided_slice %7 {offsets = [0, 0], sizes = [8, 8], strides = [1, 1]} : vector<8x32xf32> to vector<8x8xf32>
    %14 = arith.truncf %13 : vector<8x8xf32> to vector<8x8xbf16>
    %c0_11 = arith.constant 0 : index
    %c0_12 = arith.constant 0 : index
    %c0_13 = arith.constant 0 : index
    %c0_14 = arith.constant 0 : index
    %15 = vector.load %arg7[%c0_11, %c0_12, %c0_13, %c0_14] : memref<1x4x8x8xbf16, #tpu.memory_space<vmem>>, vector<1x1x8x8xbf16>
    %16 = vector.shape_cast %15 : vector<1x1x8x8xbf16> to vector<8x8xbf16>
    %17 = vector.shape_cast %14 : vector<8x8xbf16> to vector<1x1x8x8xbf16>
    tpu.vector_store %arg7[%c0_11, %c0_12, %c0_13, %c0_14], %17 {strides = array<i32>} : memref<1x4x8x8xbf16, #tpu.memory_space<vmem>>, vector<1x1x8x8xbf16>,
    %18 = vector.extract_strided_slice %12 {offsets = [0, 0], sizes = [8, 8], strides = [1, 1]} : vector<8x32xf32> to vector<8x8xf32>
    %19 = arith.truncf %18 : vector<8x8xf32> to vector<8x8xbf16>
    %c0_15 = arith.constant 0 : index
    %c0_16 = arith.constant 0 : index
    %c0_17 = arith.constant 0 : index
    %c0_18 = arith.constant 0 : index
    %20 = vector.load %arg8[%c0_15, %c0_16, %c0_17, %c0_18] : memref<1x4x8x8xbf16, #tpu.memory_space<vmem>>, vector<1x1x8x8xbf16>
    %21 = vector.shape_cast %20 : vector<1x1x8x8xbf16> to vector<8x8xbf16>
    %22 = vector.shape_cast %19 : vector<8x8xbf16> to vector<1x1x8x8xbf16>
    tpu.vector_store %arg8[%c0_15, %c0_16, %c0_17, %c0_18], %22 {strides = array<i32>} : memref<1x4x8x8xbf16, #tpu.memory_space<vmem>>, vector<1x1x8x8xbf16>,
    %23 = vector.extract_strided_slice %7 {offsets = [0, 8], sizes = [8, 8], strides = [1, 1]} : vector<8x32xf32> to vector<8x8xf32>
    %24 = arith.truncf %23 : vector<8x8xf32> to vector<8x8xbf16>
    %c0_19 = arith.constant 0 : index
    %c1 = arith.constant 1 : index
    %c0_20 = arith.constant 0 : index
    %c0_21 = arith.constant 0 : index
    %25 = vector.load %arg7[%c0_19, %c1, %c0_20, %c0_21] : memref<1x4x8x8xbf16, #tpu.memory_space<vmem>>, vector<1x1x8x8xbf16>
    %26 = vector.shape_cast %25 : vector<1x1x8x8xbf16> to vector<8x8xbf16>
    %27 = vector.shape_cast %24 : vector<8x8xbf16> to vector<1x1x8x8xbf16>
    tpu.vector_store %arg7[%c0_19, %c1, %c0_20, %c0_21], %27 {strides = array<i32>} : memref<1x4x8x8xbf16, #tpu.memory_space<vmem>>, vector<1x1x8x8xbf16>,
    %28 = vector.extract_strided_slice %12 {offsets = [0, 8], sizes = [8, 8], strides = [1, 1]} : vector<8x32xf32> to vector<8x8xf32>
    %29 = arith.truncf %28 : vector<8x8xf32> to vector<8x8xbf16>
    %c0_22 = arith.constant 0 : index
    %c1_23 = arith.constant 1 : index
    %c0_24 = arith.constant 0 : index
    %c0_25 = arith.constant 0 : index
    %30 = vector.load %arg8[%c0_22, %c1_23, %c0_24, %c0_25] : memref<1x4x8x8xbf16, #tpu.memory_space<vmem>>, vector<1x1x8x8xbf16>
    %31 = vector.shape_cast %30 : vector<1x1x8x8xbf16> to vector<8x8xbf16>
    %32 = vector.shape_cast %29 : vector<8x8xbf16> to vector<1x1x8x8xbf16>
    tpu.vector_store %arg8[%c0_22, %c1_23, %c0_24, %c0_25], %32 {strides = array<i32>} : memref<1x4x8x8xbf16, #tpu.memory_space<vmem>>, vector<1x1x8x8xbf16>,
    %33 = vector.extract_strided_slice %7 {offsets = [0, 16], sizes = [8, 8], strides = [1, 1]} : vector<8x32xf32> to vector<8x8xf32>
    %34 = arith.truncf %33 : vector<8x8xf32> to vector<8x8xbf16>
    %c0_26 = arith.constant 0 : index
    %c2 = arith.constant 2 : index
    %c0_27 = arith.constant 0 : index
    %c0_28 = arith.constant 0 : index
    %35 = vector.load %arg7[%c0_26, %c2, %c0_27, %c0_28] : memref<1x4x8x8xbf16, #tpu.memory_space<vmem>>, vector<1x1x8x8xbf16>
    %36 = vector.shape_cast %35 : vector<1x1x8x8xbf16> to vector<8x8xbf16>
    %37 = vector.shape_cast %34 : vector<8x8xbf16> to vector<1x1x8x8xbf16>
    tpu.vector_store %arg7[%c0_26, %c2, %c0_27, %c0_28], %37 {strides = array<i32>} : memref<1x4x8x8xbf16, #tpu.memory_space<vmem>>, vector<1x1x8x8xbf16>,
    %38 = vector.extract_strided_slice %12 {offsets = [0, 16], sizes = [8, 8], strides = [1, 1]} : vector<8x32xf32> to vector<8x8xf32>
    %39 = arith.truncf %38 : vector<8x8xf32> to vector<8x8xbf16>
    %c0_29 = arith.constant 0 : index
    %c2_30 = arith.constant 2 : index
    %c0_31 = arith.constant 0 : index
    %c0_32 = arith.constant 0 : index
    %40 = vector.load %arg8[%c0_29, %c2_30, %c0_31, %c0_32] : memref<1x4x8x8xbf16, #tpu.memory_space<vmem>>, vector<1x1x8x8xbf16>
    %41 = vector.shape_cast %40 : vector<1x1x8x8xbf16> to vector<8x8xbf16>
    %42 = vector.shape_cast %39 : vector<8x8xbf16> to vector<1x1x8x8xbf16>
    tpu.vector_store %arg8[%c0_29, %c2_30, %c0_31, %c0_32], %42 {strides = array<i32>} : memref<1x4x8x8xbf16, #tpu.memory_space<vmem>>, vector<1x1x8x8xbf16>,
    %43 = vector.extract_strided_slice %7 {offsets = [0, 24], sizes = [8, 8], strides = [1, 1]} : vector<8x32xf32> to vector<8x8xf32>
    %44 = arith.truncf %43 : vector<8x8xf32> to vector<8x8xbf16>
    %c0_33 = arith.constant 0 : index
    %c3 = arith.constant 3 : index
    %c0_34 = arith.constant 0 : index
    %c0_35 = arith.constant 0 : index
    %45 = vector.load %arg7[%c0_33, %c3, %c0_34, %c0_35] : memref<1x4x8x8xbf16, #tpu.memory_space<vmem>>, vector<1x1x8x8xbf16>
    %46 = vector.shape_cast %45 : vector<1x1x8x8xbf16> to vector<8x8xbf16>
    %47 = vector.shape_cast %44 : vector<8x8xbf16> to vector<1x1x8x8xbf16>
    tpu.vector_store %arg7[%c0_33, %c3, %c0_34, %c0_35], %47 {strides = array<i32>} : memref<1x4x8x8xbf16, #tpu.memory_space<vmem>>, vector<1x1x8x8xbf16>,
    %48 = vector.extract_strided_slice %12 {offsets = [0, 24], sizes = [8, 8], strides = [1, 1]} : vector<8x32xf32> to vector<8x8xf32>
    %49 = arith.truncf %48 : vector<8x8xf32> to vector<8x8xbf16>
    %c0_36 = arith.constant 0 : index
    %c3_37 = arith.constant 3 : index
    %c0_38 = arith.constant 0 : index
    %c0_39 = arith.constant 0 : index
    %50 = vector.load %arg8[%c0_36, %c3_37, %c0_38, %c0_39] : memref<1x4x8x8xbf16, #tpu.memory_space<vmem>>, vector<1x1x8x8xbf16>
    %51 = vector.shape_cast %50 : vector<1x1x8x8xbf16> to vector<8x8xbf16>
    %52 = vector.shape_cast %49 : vector<8x8xbf16> to vector<1x1x8x8xbf16>
    tpu.vector_store %arg8[%c0_36, %c3_37, %c0_38, %c0_39], %52 {strides = array<i32>} : memref<1x4x8x8xbf16, #tpu.memory_space<vmem>>, vector<1x1x8x8xbf16>,
    return
  }
  func.func @transform_0(%arg0: i32, %arg1: i32) -> (i32, i32, i32) {
    %c0_i32 = arith.constant 0 : i32
    %c0_i32_0 = arith.constant 0 : i32
    return %arg0, %arg1, %c0_i32 : i32, i32, i32
  }
  func.func @transform_1(%arg0: i32, %arg1: i32) -> (i32, i32) {
    %c0_i32 = arith.constant 0 : i32
    %c0_i32_0 = arith.constant 0 : i32
    %c0_i32_1 = arith.constant 0 : i32
    return %c0_i32, %c0_i32_0 : i32, i32
  }
  func.func @transform_2(%arg0: i32, %arg1: i32) -> (i32, i32) {
    %c0_i32 = arith.constant 0 : i32
    %c0_i32_0 = arith.constant 0 : i32
    %c0_i32_1 = arith.constant 0 : i32
    return %c0_i32, %c0_i32_0 : i32, i32
  }
  func.func @transform_3(%arg0: i32, %arg1: i32) -> (i32, i32) {
    %c0_i32 = arith.constant 0 : i32
    %c0_i32_0 = arith.constant 0 : i32
    %c0_i32_1 = arith.constant 0 : i32
    return %c0_i32, %c0_i32_0 : i32, i32
  }
  func.func @transform_4(%arg0: i32, %arg1: i32) -> (i32, i32) {
    %c0_i32 = arith.constant 0 : i32
    %c0_i32_0 = arith.constant 0 : i32
    %c0_i32_1 = arith.constant 0 : i32
    return %c0_i32, %c0_i32_0 : i32, i32
  }
  func.func @transform_5(%arg0: i32, %arg1: i32) -> (i32, i32, i32, i32) {
    %c0_i32 = arith.constant 0 : i32
    %c0_i32_0 = arith.constant 0 : i32
    %c0_i32_1 = arith.constant 0 : i32
    return %arg0, %c0_i32, %arg1, %c0_i32_0 : i32, i32, i32, i32
  }
  func.func @transform_6(%arg0: i32, %arg1: i32) -> (i32, i32, i32, i32) {
    %c0_i32 = arith.constant 0 : i32
    %c0_i32_0 = arith.constant 0 : i32
    %c0_i32_1 = arith.constant 0 : i32
    return %arg0, %c0_i32, %arg1, %c0_i32_0 : i32, i32, i32, i32
  }
}

module attributes {stable_mosaic.version = 11 : i64} {
  func.func @_kv_proj_kernel(%arg0: i32, %arg1: i32, %arg2: memref<1x8x32xf32, #tpu.memory_space<vmem>>, %arg3: memref<32x32xbf16, #tpu.memory_space<vmem>>, %arg4: memref<1x32xf32, #tpu.memory_space<vmem>>, %arg5: memref<32x32xbf16, #tpu.memory_space<vmem>>, %arg6: memref<1x32xf32, #tpu.memory_space<vmem>>, %arg7: memref<1x4x8x8xbf16, #tpu.memory_space<vmem>>, %arg8: memref<1x4x8x8xbf16, #tpu.memory_space<vmem>>) attributes {dimension_semantics = [#tpu.dimension_semantics<parallel>, #tpu.dimension_semantics<parallel>], iteration_bounds = array<i64: 2, 1>, scalar_prefetch = 0 : i64, scratch_operands = 0 : i64, tpu.core_type = #tpu.core_type<tc>, window_params = [{transform_indices = @transform_0, window_bounds = array<i64: 1, 8, 32>}, {pipeline_mode = #tpu.pipeline_mode<synchronous>, transform_indices = @transform_1, window_bounds = array<i64: 32, 32>}, {pipeline_mode = #tpu.pipeline_mode<synchronous>, transform_indices = @transform_2, window_bounds = array<i64: 1, 32>}, {pipeline_mode = #tpu.pipeline_mode<synchronous>, transform_indices = @transform_3, window_bounds = array<i64: 32, 32>}, {pipeline_mode = #tpu.pipeline_mode<synchronous>, transform_indices = @transform_4, window_bounds = array<i64: 1, 32>}, {transform_indices = @transform_5, window_bounds = array<i64: 1, 4, 8, 8>}, {transform_indices = @transform_6, window_bounds = array<i64: 1, 4, 8, 8>}]} {
    %c0 = arith.constant 0 : index
    %c0_0 = arith.constant 0 : index
    %c0_1 = arith.constant 0 : index
    %0 = vector.load %arg2[%c0, %c0_0, %c0_1] : memref<1x8x32xf32, #tpu.memory_space<vmem>>, vector<1x8x32xf32>
    %1 = vector.shape_cast %0 : vector<1x8x32xf32> to vector<8x32xf32>
    %2 = arith.truncf %1 : vector<8x32xf32> to vector<8x32xbf16>
    %c0_2 = arith.constant 0 : index
    %c0_3 = arith.constant 0 : index
    %3 = vector.load %arg3[%c0_2, %c0_3] : memref<32x32xbf16, #tpu.memory_space<vmem>>, vector<32x32xbf16>
    %cst = arith.constant dense<0.000000e+00> : vector<8x32xf32>
    %4 = tpu.matmul %2, %3, %cst {dimension_numbers = #tpu.dot_dimension_numbers<[1], [0], [0], [1], [0, 0, 1, 1], [], []>} : vector<8x32xbf16>, vector<32x32xbf16>, vector<8x32xf32> -> vector<8x32xf32>
    %c0_4 = arith.constant 0 : index
    %c0_5 = arith.constant 0 : index
    %5 = vector.load %arg4[%c0_4, %c0_5] : memref<1x32xf32, #tpu.memory_space<vmem>>, vector<1x32xf32>
    %6 = vector.broadcast %5 : vector<1x32xf32> to vector<8x32xf32>
    %7 = arith.addf %4, %6 : vector<8x32xf32>
    %c0_6 = arith.constant 0 : index
    %c0_7 = arith.constant 0 : index
    %8 = vector.load %arg5[%c0_6, %c0_7] : memref<32x32xbf16, #tpu.memory_space<vmem>>, vector<32x32xbf16>
    %cst_8 = arith.constant dense<0.000000e+00> : vector<8x32xf32>
    %9 = tpu.matmul %2, %8, %cst_8 {dimension_numbers = #tpu.dot_dimension_numbers<[1], [0], [0], [1], [0, 0, 1, 1], [], []>} : vector<8x32xbf16>, vector<32x32xbf16>, vector<8x32xf32> -> vector<8x32xf32>
    %c0_9 = arith.constant 0 : index
    %c0_10 = arith.constant 0 : index
    %10 = vector.load %arg6[%c0_9, %c0_10] : memref<1x32xf32, #tpu.memory_space<vmem>>, vector<1x32xf32>
    %11 = vector.broadcast %10 : vector<1x32xf32> to vector<8x32xf32>
    %12 = arith.addf %9, %11 : vector<8x32xf32>
    %13 = vector.extract_strided_slice %7 {offsets = [0, 0], sizes = [8, 8], strides = [1, 1]} : vector<8x32xf32> to vector<8x8xf32>
    %14 = arith.truncf %13 : vector<8x8xf32> to vector<8x8xbf16>
    %c0_11 = arith.constant 0 : index
    %c0_12 = arith.constant 0 : index
    %c0_13 = arith.constant 0 : index
    %c0_14 = arith.constant 0 : index
    %15 = vector.load %arg7[%c0_11, %c0_12, %c0_13, %c0_14] : memref<1x4x8x8xbf16, #tpu.memory_space<vmem>>, vector<1x1x8x8xbf16>
    %16 = vector.shape_cast %15 : vector<1x1x8x8xbf16> to vector<8x8xbf16>
    %17 = vector.shape_cast %14 : vector<8x8xbf16> to vector<1x1x8x8xbf16>
    tpu.vector_store %arg7[%c0_11, %c0_12, %c0_13, %c0_14], %17 {strides = array<i32>} : memref<1x4x8x8xbf16, #tpu.memory_space<vmem>>, vector<1x1x8x8xbf16>,
    %18 = vector.extract_strided_slice %12 {offsets = [0, 0], sizes = [8, 8], strides = [1, 1]} : vector<8x32xf32> to vector<8x8xf32>
    %19 = arith.truncf %18 : vector<8x8xf32> to vector<8x8xbf16>
    %c0_15 = arith.constant 0 : index
    %c0_16 = arith.constant 0 : index
    %c0_17 = arith.constant 0 : index
    %c0_18 = arith.constant 0 : index
    %20 = vector.load %arg8[%c0_15, %c0_16, %c0_17, %c0_18] : memref<1x4x8x8xbf16, #tpu.memory_space<vmem>>, vector<1x1x8x8xbf16>
    %21 = vector.shape_cast %20 : vector<1x1x8x8xbf16> to vector<8x8xbf16>
    %22 = vector.shape_cast %19 : vector<8x8xbf16> to vector<1x1x8x8xbf16>
    tpu.vector_store %arg8[%c0_15, %c0_16, %c0_17, %c0_18], %22 {strides = array<i32>} : memref<1x4x8x8xbf16, #tpu.memory_space<vmem>>, vector<1x1x8x8xbf16>,
    %23 = vector.extract_strided_slice %7 {offsets = [0, 8], sizes = [8, 8], strides = [1, 1]} : vector<8x32xf32> to vector<8x8xf32>
    %24 = arith.truncf %23 : vector<8x8xf32> to vector<8x8xbf16>
    %c0_19 = arith.constant 0 : index
    %c1 = arith.constant 1 : index
    %c0_20 = arith.constant 0 : index
    %c0_21 = arith.constant 0 : index
    %25 = vector.load %arg7[%c0_19, %c1, %c0_20, %c0_21] : memref<1x4x8x8xbf16, #tpu.memory_space<vmem>>, vector<1x1x8x8xbf16>
    %26 = vector.shape_cast %25 : vector<1x1x8x8xbf16> to vector<8x8xbf16>
    %27 = vector.shape_cast %24 : vector<8x8xbf16> to vector<1x1x8x8xbf16>
    tpu.vector_store %arg7[%c0_19, %c1, %c0_20, %c0_21], %27 {strides = array<i32>} : memref<1x4x8x8xbf16, #tpu.memory_space<vmem>>, vector<1x1x8x8xbf16>,
    %28 = vector.extract_strided_slice %12 {offsets = [0, 8], sizes = [8, 8], strides = [1, 1]} : vector<8x32xf32> to vector<8x8xf32>
    %29 = arith.truncf %28 : vector<8x8xf32> to vector<8x8xbf16>
    %c0_22 = arith.constant 0 : index
    %c1_23 = arith.constant 1 : index
    %c0_24 = arith.constant 0 : index
    %c0_25 = arith.constant 0 : index
    %30 = vector.load %arg8[%c0_22, %c1_23, %c0_24, %c0_25] : memref<1x4x8x8xbf16, #tpu.memory_space<vmem>>, vector<1x1x8x8xbf16>
    %31 = vector.shape_cast %30 : vector<1x1x8x8xbf16> to vector<8x8xbf16>
    %32 = vector.shape_cast %29 : vector<8x8xbf16> to vector<1x1x8x8xbf16>
    tpu.vector_store %arg8[%c0_22, %c1_23, %c0_24, %c0_25], %32 {strides = array<i32>} : memref<1x4x8x8xbf16, #tpu.memory_space<vmem>>, vector<1x1x8x8xbf16>,
    %33 = vector.extract_strided_slice %7 {offsets = [0, 16], sizes = [8, 8], strides = [1, 1]} : vector<8x32xf32> to vector<8x8xf32>
    %34 = arith.truncf %33 : vector<8x8xf32> to vector<8x8xbf16>
    %c0_26 = arith.constant 0 : index
    %c2 = arith.constant 2 : index
    %c0_27 = arith.constant 0 : index
    %c0_28 = arith.constant 0 : index
    %35 = vector.load %arg7[%c0_26, %c2, %c0_27, %c0_28] : memref<1x4x8x8xbf16, #tpu.memory_space<vmem>>, vector<1x1x8x8xbf16>
    %36 = vector.shape_cast %35 : vector<1x1x8x8xbf16> to vector<8x8xbf16>
    %37 = vector.shape_cast %34 : vector<8x8xbf16> to vector<1x1x8x8xbf16>
    tpu.vector_store %arg7[%c0_26, %c2, %c0_27, %c0_28], %37 {strides = array<i32>} : memref<1x4x8x8xbf16, #tpu.memory_space<vmem>>, vector<1x1x8x8xbf16>,
    %38 = vector.extract_strided_slice %12 {offsets = [0, 16], sizes = [8, 8], strides = [1, 1]} : vector<8x32xf32> to vector<8x8xf32>
    %39 = arith.truncf %38 : vector<8x8xf32> to vector<8x8xbf16>
    %c0_29 = arith.constant 0 : index
    %c2_30 = arith.constant 2 : index
    %c0_31 = arith.constant 0 : index
    %c0_32 = arith.constant 0 : index
    %40 = vector.load %arg8[%c0_29, %c2_30, %c0_31, %c0_32] : memref<1x4x8x8xbf16, #tpu.memory_space<vmem>>, vector<1x1x8x8xbf16>
    %41 = vector.shape_cast %40 : vector<1x1x8x8xbf16> to vector<8x8xbf16>
    %42 = vector.shape_cast %39 : vector<8x8xbf16> to vector<1x1x8x8xbf16>
    tpu.vector_store %arg8[%c0_29, %c2_30, %c0_31, %c0_32], %42 {strides = array<i32>} : memref<1x4x8x8xbf16, #tpu.memory_space<vmem>>, vector<1x1x8x8xbf16>,
    %43 = vector.extract_strided_slice %7 {offsets = [0, 24], sizes = [8, 8], strides = [1, 1]} : vector<8x32xf32> to vector<8x8xf32>
    %44 = arith.truncf %43 : vector<8x8xf32> to vector<8x8xbf16>
    %c0_33 = arith.constant 0 : index
    %c3 = arith.constant 3 : index
    %c0_34 = arith.constant 0 : index
    %c0_35 = arith.constant 0 : index
    %45 = vector.load %arg7[%c0_33, %c3, %c0_34, %c0_35] : memref<1x4x8x8xbf16, #tpu.memory_space<vmem>>, vector<1x1x8x8xbf16>
    %46 = vector.shape_cast %45 : vector<1x1x8x8xbf16> to vector<8x8xbf16>
    %47 = vector.shape_cast %44 : vector<8x8xbf16> to vector<1x1x8x8xbf16>
    tpu.vector_store %arg7[%c0_33, %c3, %c0_34, %c0_35], %47 {strides = array<i32>} : memref<1x4x8x8xbf16, #tpu.memory_space<vmem>>, vector<1x1x8x8xbf16>,
    %48 = vector.extract_strided_slice %12 {offsets = [0, 24], sizes = [8, 8], strides = [1, 1]} : vector<8x32xf32> to vector<8x8xf32>
    %49 = arith.truncf %48 : vector<8x8xf32> to vector<8x8xbf16>
    %c0_36 = arith.constant 0 : index
    %c3_37 = arith.constant 3 : index
    %c0_38 = arith.constant 0 : index
    %c0_39 = arith.constant 0 : index
    %50 = vector.load %arg8[%c0_36, %c3_37, %c0_38, %c0_39] : memref<1x4x8x8xbf16, #tpu.memory_space<vmem>>, vector<1x1x8x8xbf16>
    %51 = vector.shape_cast %50 : vector<1x1x8x8xbf16> to vector<8x8xbf16>
    %52 = vector.shape_cast %49 : vector<8x8xbf16> to vector<1x1x8x8xbf16>
    tpu.vector_store %arg8[%c0_36, %c3_37, %c0_38, %c0_39], %52 {strides = array<i32>} : memref<1x4x8x8xbf16, #tpu.memory_space<vmem>>, vector<1x1x8x8xbf16>,
    return
  }
  func.func @transform_0(%arg0: i32, %arg1: i32) -> (i32, i32, i32) {
    %c0_i32 = arith.constant 0 : i32
    %c0_i32_0 = arith.constant 0 : i32
    return %arg0, %arg1, %c0_i32 : i32, i32, i32
  }
  func.func @transform_1(%arg0: i32, %arg1: i32) -> (i32, i32) {
    %c0_i32 = arith.constant 0 : i32
    %c0_i32_0 = arith.constant 0 : i32
    %c0_i32_1 = arith.constant 0 : i32
    return %c0_i32, %c0_i32_0 : i32, i32
  }
  func.func @transform_2(%arg0: i32, %arg1: i32) -> (i32, i32) {
    %c0_i32 = arith.constant 0 : i32
    %c0_i32_0 = arith.constant 0 : i32
    %c0_i32_1 = arith.constant 0 : i32
    return %c0_i32, %c0_i32_0 : i32, i32
  }
  func.func @transform_3(%arg0: i32, %arg1: i32) -> (i32, i32) {
    %c0_i32 = arith.constant 0 : i32
    %c0_i32_0 = arith.constant 0 : i32
    %c0_i32_1 = arith.constant 0 : i32
    return %c0_i32, %c0_i32_0 : i32, i32
  }
  func.func @transform_4(%arg0: i32, %arg1: i32) -> (i32, i32) {
    %c0_i32 = arith.constant 0 : i32
    %c0_i32_0 = arith.constant 0 : i32
    %c0_i32_1 = arith.constant 0 : i32
    return %c0_i32, %c0_i32_0 : i32, i32
  }
  func.func @transform_5(%arg0: i32, %arg1: i32) -> (i32, i32, i32, i32) {
    %c0_i32 = arith.constant 0 : i32
    %c0_i32_0 = arith.constant 0 : i32
    %c0_i32_1 = arith.constant 0 : i32
    return %arg0, %c0_i32, %arg1, %c0_i32_0 : i32, i32, i32, i32
  }
  func.func @transform_6(%arg0: i32, %arg1: i32) -> (i32, i32, i32, i32) {
    %c0_i32 = arith.constant 0 : i32
    %c0_i32_0 = arith.constant 0 : i32
    %c0_i32_1 = arith.constant 0 : i32
    return %arg0, %c0_i32, %arg1, %c0_i32_0 : i32, i32, i32, i32
  }
}

</mosaic_0001>

<bundles_post_ra>
// kernel: tpu_custom_call.1
= control target key start
LH: loop header
LB: loop body
LE: loop exit
PB: predicated region body
PF: predicated region fallthrough
CT: control target
= control target key end

     0   :  { %12 = vsyncpa [#allocation3], 0  ;;  %s1405_s0 = inlined_call_operand.hbm [shape: f32[2,8,32], index: 0, kind: input, shape index: {}]   ;;  %s1406_s1 = inlined_call_operand.hbm [shape: bf16[32,32], index: 1, kind: input, shape index: {}]   ;;  %s1407_s2 = inlined_call_operand.vmem [shape: f32[1,32], index: 2, kind: input, shape index: {}]   ;;  %s1408_s3 = inlined_call_operand.hbm [shape: bf16[32,32], index: 3, kind: input, shape index: {}]   ;;  %s1409_s4 = inlined_call_operand.vmem [shape: f32[1,32], index: 4, kind: input, shape index: {}]   ;;  %s1410_s5 = inlined_call_operand.hbm [shape: bf16[2,4,8,8], index: 5, kind: output, shape index: {0}]   ;;  %s1411_s6 = inlined_call_operand.hbm [shape: bf16[2,4,8,8], index: 6, kind: output, shape index: {1}]  }
   0x1   :  { %14 = vsyncpa [#allocation3 + $0x1], 0 }
   0x2   :  { %15 = vsyncpa [#allocation6], 0 }
   0x3   :  { %16 = vsyncpa [#allocation4], 0 }
   0x4   :  { %18 = vsyncpa [#allocation4 + $0x1], 0 }
   0x5   :  { %19 = vsyncpa [#allocation10], 0 }
   0x6   :  { %21 = vsyncpa [#allocation10 + $0x1], 0  ;;  %s1094_s21 = smov 0   ;;  %s1096_s22 = smov 0  }
   0x7   :  { %s1098_s23 = smov 0   ;;  %s1100_s24 = smov 0  }
   0x8   :  { %s1102_s25 = smov 0   ;;  %s1104_s26 = smov 0  }
   0x9 LB: > { %s674_s27 = sadd.s32 4294967295, %s1043_s26   ;;  %s675_s28 = sadd.s32 4294967294, %s1043_s26   ;;  %s1043_s26 = sphi %s1104_s26, %s27_s26   ;;  %s1039_s25 = sphi %s1102_s25, %s1436_s25   ;;  %s1035_s24 = sphi %s1100_s24, %s1435_s24   ;;  %s1031_s23 = sphi %s1098_s23, %s1434_s23   ;;  %s1027_s22 = sphi %s1096_s22, %s1433_s22   ;;  %s1023_s21 = sphi %s1094_s21, %s1432_s21  }
   0xa   : > { %p61_p0 = scmp.ne.s32.totalorder %s1027_s22, %s1023_s21  ;;  %p1128_p1 = scmp.eq.s32.totalorder %s674_s27, 0 }
   0xb   : > { %p1132_p2 = scmp.eq.s32.totalorder %s674_s27, 1  ;;  %p177_p3 = scmp.eq.s32.totalorder %s675_s28, 1 }
   0xc   : > { %s1417_s29 = scalar_select %p1128_p1, 1, 0 }
   0xd   : > { %p1138_p4 = por %p1128_p1, %p61_p0  ;;  %p676_p5 = scmp.ge.s32.totalorder %s1043_s26, 1 }
   0xe   : > { %p1143_p6 = por %p177_p3, %p61_p0  ;;  %p212_p7 = scmp.lt.s32.totalorder %s1043_s26, 3 }
   0xf   : > { %s1419_s7 = scalar_select %p1138_p4, 1, 0 }
  0x10   : > { %s1420_s8 = scalar_select %p1143_p6, 1, 0 }
  0x11   : > { %p1148_p8 = pnand %p676_p5, %p212_p7  ;;  %s1045_s10 = smov [#allocation5]  }
  0x12   : > { %1421 = sst [smem:[#allocation15_spill]] %s1420_s8  ;;  %s224_s11 = sshll.u32 %s1045_s10, 4  ;;  %s1152_s11 = int_to_ptr.vmem [resolvable:$true] %s224_s11 }
  0x13   : > { %p752_p9 = pneg %p1148_p8  ;;  %s1046_s13 = smov [#allocation7]  }
  0x14   : > { %s240_s14 = sshll.u32 %s1046_s13, 4  ;;  %s839_s17 = scalar_lea.hbm %s1406_s1, 256  ;;  %s1163_s14 = int_to_ptr.vmem [resolvable:$true] %s240_s14 }
  0x15   : > { %p1159_p11 = pnand %p752_p9, %p1128_p1  ;;  %p840_p12 = scmp.ne.s32.totalorder %s1406_s1, %s839_s17 }
  0x16   : > { %p846_p5 = scmp.lt.u32.totalorder %s839_s17, %s1406_s1 }
  0x17   : > { %p841_p13 = pneg %p1159_p11 }
  0x19   : > { %p842_p0 = pnand %p841_p13, %p840_p12 }
  0x1b   : > { %p843_p3 = pneg %p842_p0 }
  0x1d   : > { %p848_p7 = pnand %p846_p5, %p843_p3 }
  0x1f   : > { %851 = shalt.err (!%p848_p7)
}
  0x20   : > { %s852_s28 = scalar_lea.vmem %s1152_s11, 256  ;;  %p860_p1 = scmp.lt.s32.totalorder %s1152_s11, %s1152_s11 }
  0x21   : > { %p853_p9 = scmp.ne.s32.totalorder %s1152_s11, %s852_s28  ;;  %p861_p12 = scmp.lt.s32.totalorder %s852_s28, %s852_s28 }
  0x23   : > { %p855_p10 = pnand %p853_p9, %p841_p13  ;;  %p862_p0 = por %p861_p12, %p860_p1 }
  0x25   : > { %p856_p6 = pneg %p855_p10 }
  0x27   : > { %p863_p4 = pnand %p862_p0, %p856_p6 }
  0x29   : > { %866 = shalt.err (!%p863_p4)
}
  0x2a   : > { %s1047_s10 = smov 64   ;;  %s1048_s13 = smov 4  }
  0x2b   : > { %755 = dma.hbm_to_vmem [thread:$0]  (!%p1159_p11), %s1406_s1, 256, %s1152_s11, [#allocation6], %s1047_s10, %s1047_s10, %s1048_s13  }
  0x2c   : > { %s867_s19 = scalar_lea.hbm %s1408_s3, 256 }
  0x2d   : > { %p868_p1 = scmp.ne.s32.totalorder %s1408_s3, %s867_s19  ;;  %p874_p10 = scmp.lt.u32.totalorder %s867_s19, %s1408_s3 }
  0x2f   : > { %p870_p4 = pnand %p868_p1, %p841_p13 }
  0x31   : > { %p871_p6 = pneg %p870_p4 }
  0x33   : > { %p876_p3 = pnand %p874_p10, %p871_p6 }
  0x35   : > { %879 = shalt.err (!%p876_p3)
}
  0x36   : > { %s880_s11 = scalar_lea.vmem %s1163_s14, 256  ;;  %p888_p12 = scmp.lt.s32.totalorder %s1163_s14, %s1163_s14 }
  0x37   : > { %p881_p5 = scmp.ne.s32.totalorder %s1163_s14, %s880_s11  ;;  %p889_p0 = scmp.lt.s32.totalorder %s880_s11, %s880_s11 }
  0x39   : > { %p883_p7 = pnand %p881_p5, %p841_p13  ;;  %p890_p1 = por %p889_p0, %p888_p12 }
  0x3b   : > { %p884_p9 = pneg %p883_p7 }
  0x3d   : > { %p891_p4 = pnand %p890_p1, %p884_p9 }
  0x3f   : > { %894 = shalt.err (!%p891_p4)
}
  0x40   : > { %758 = dma.hbm_to_vmem [thread:$0]  (!%p1159_p11), %s1408_s3, 256, %s1163_s14, [#allocation6], %s1047_s10, %s1047_s10, %s1048_s13  }
  0x41   : > { %s39_s16 = sadd.s32 1, %s1039_s25  ;;  %s48_s17 = sadd.s32 1, %s1031_s23 }
  0x42   : > { %p41_p13 = scmp.ge.s32.totalorder %s39_s16, 2  ;;  %p55_p6 = scmp.ne.s32.totalorder %s1031_s23, %s1027_s22 }
  0x43   : > { %p56_p10 = scmp.eq.s32.totalorder %s1043_s26, 0  ;;  %p772_p3 = scmp.lt.s32.totalorder %s1043_s26, 2 }
  0x44   : > { %s1438_s16 = smov (%p41_p13, %s39_s16), 0  ;;  %p1227_p7 = por %p1132_p2, %p55_p6 }
  0x45   : > { %p57_p5 = por %p56_p10, %p55_p6  ;;  %s43_s18 = ssub.s32 %s1039_s25, %s1438_s16 }
  0x46   : > { %s1424_s12 = scalar_select %p1227_p7, 1, 0 }
  0x47   : > { %s257_s19 = sand.u32 1, %s1031_s23   ;;  %p46_p9 = scmp.eq.s32.totalorder %s43_s18, 0 }
  0x48   : > { %s680_s14 = sshll.u32 %s257_s19, 3  ;;  %s681_s10 = sshll.u32 %s1039_s25, 7 }
  0x49   : > { %s1236_s13 = scalar_select %p46_p9, %s1031_s23, %s48_s17  }
  0x4a   : > { %s1241_s28 = scalar_lea.hbm %s1405_s0, %s681_s10  ;;  %s261_s30 = scalar_lea.vmem [#allocation2], %s680_s14 }
  0x4b   : > { %s269_s11 = sshll.u32 %s261_s30, 4  ;;  %p1245_p2 = pnand %p772_p3, %p57_p5  ;;  %s1249_s11 = int_to_ptr.vmem [resolvable:$true] %s269_s11 }
  0x4c   : > { %s258_s15 = scalar_lea.sflag [#allocation3], %s257_s19  ;;  %s895_s17 = scalar_lea.hbm %s1241_s28, 128 }
  0x4d   : > { %p896_p11 = scmp.ne.s32.totalorder %s1241_s28, %s895_s17  ;;  %p897_p12 = pneg %p1245_p2 }
  0x4e   : > { %s900_s10 = scalar_lea.hbm %s1405_s0, 256  ;;  %p901_p4 = scmp.lt.u32.totalorder %s1241_s28, %s1405_s0 }
  0x4f   : > { %p898_p0 = pnand %p897_p12, %p896_p11  ;;  %p902_p13 = scmp.lt.u32.totalorder %s900_s10, %s895_s17 }
  0x50   : > { %p904_p10 = scmp.lt.u32.totalorder %s895_s17, %s1241_s28 }
  0x51   : > { %p899_p1 = pneg %p898_p0  ;;  %p903_p6 = por %p902_p13, %p901_p4 }
  0x53   : > { %p905_p3 = por %p904_p10, %p903_p6 }
  0x55   : > { %p906_p5 = pnand %p905_p3, %p899_p1 }
  0x57   : > { %909 = shalt.err (!%p906_p5)
}
  0x58   : > { %s910_s19 = scalar_lea.vmem %s1249_s11, 128  ;;  %s1049_s30 = smov [#allocation2]  }
  0x59   : > { %p911_p9 = scmp.ne.s32.totalorder %s1249_s11, %s910_s19  ;;  %s915_s18 = sshll.u32 %s1049_s30, 4  ;;  %s916_s18 = int_to_ptr.vmem [resolvable:$false] %s915_s18 }
  0x5a   : > { %s917_s14 = scalar_lea.vmem %s916_s18, 256  ;;  %p918_p7 = scmp.lt.s32.totalorder %s1249_s11, %s916_s18 }
  0x5b   : > { %p913_p11 = pnand %p911_p9, %p897_p12  ;;  %p919_p4 = scmp.lt.s32.totalorder %s917_s14, %s910_s19 }
  0x5d   : > { %p914_p0 = pneg %p913_p11  ;;  %p920_p13 = por %p919_p4, %p918_p7 }
  0x5f   : > { %p921_p6 = pnand %p920_p13, %p914_p0 }
  0x61   : > { %924 = shalt.err (!%p921_p6)
}
  0x62   : > { %762 = dma.hbm_to_vmem [thread:$0]  (!%p1245_p2), %s1241_s28, 128, %s1249_s11, %s258_s15  }
  0x63   : > { %278 = sbr.rel (%p1148_p8) target bundleno = 497 (0x1f1), region = 40  ;;  %s1279_s17 = sand.u32 (!%p1148_p8), 1, %s1027_s22  }
  0x64   : > { %s683_s10 = sshll.u32 (!%p1148_p8), %s1279_s17, 3  ;;  %s281_s20 = scalar_lea.sflag (!%p1148_p8), [#allocation3], %s1279_s17 }
  0x65   : > { %s284_s27 = scalar_lea.vmem (!%p1148_p8), [#allocation2], %s683_s10  ;;  %p1426_p7 = scmp.ne.s32.totalorder (!%p1148_p8), %s1419_s7, 0 }
  0x6a   : > { %1006 = dma.done.wait (%p1426_p7), %s281_s20, 128  }
  0x6b   : > { %1008 = vsyncadd (%p1426_p7), %s281_s20, 4294967168  ;;  %p1427_p12 = scmp.ne.s32.totalorder %s1417_s29, 0 }
  0x6d   : > { %1010 = dma.done.wait (%p1427_p12), [#allocation6], 512  }
  0x6e   : > { %1012 = vsyncadd (%p1427_p12), [#allocation6], 4294966784  ;;  %v1050_v0 = vmov 0.0   ;;  %vm1051_vm0 = vmmov 0   ;;  %v835_v1 = vld [vmem:[#allocation5] sm:$0xff]   ;;  %v836_v2 = vld [vmem:[#allocation7] sm:$0xff]  }
  0x6f   : > { %722 = vmatprep.subr.bf16.mxu0 %v1050_v0  ;;  %730 = vmatprep.subr.bf16.mxu1 %v1050_v0  ;;  %v837_v3 = vld [vmem:[#allocation5 + $0x8] sm:$0xff]   ;;  %v838_v4 = vld [vmem:[#allocation7 + $0x8] sm:$0xff]   ;;  %vm352_vm1 = vcmask 261120   ;;  %s686_s29 = sshll.u32 %s1279_s17, 4  ;;  %v688_v7 = vld [vmem:[%s1407_s2] ss:$0 sm:$0xff] }
  0x70   : > { %726 = vmatprep.mubr.msk.bf16.mxu0 %vm1051_vm0, %v1050_v0  ;;  %734 = vmatprep.mubr.msk.bf16.mxu1 %vm1051_vm0, %v1050_v0  ;;  %v327_v5 = vld [vmem:[%s284_s27] sm:$0xff]  ;;  %vm460_vm2 = vcmask 60416   ;;  %s1298_s8 = scalar_lea.vmem [#allocation8], %s686_s29  ;;  %s1052_s15 = smov 112  }
  0x71   : > { %723 = vmatpush3.bf16.msra.mxu0 %v835_v1  ;;  %731 = vmatpush3.bf16.msra.mxu1 %v836_v2  ;;  %v328_v6 = vpack.c.bf16 %v327_v5, %v327_v5  ;;  %v692_v8 = vld [vmem:[%s1409_s4] ss:$0 sm:$0xff]  ;;  %s1053_s19 = smov 120   ;;  %s325_s30 = scalar_lea.vmem [#allocation9], %s686_s29 }
  0x72   : > { %724 = vmatprep.subr.bf16.mxu0 %v1050_v0  ;;  %732 = vmatprep.subr.bf16.mxu1 %v1050_v0  ;;  %s1054_s18 = smov 104   ;;  %s520_s14 = sshll.u32 %s1298_s8, 4  ;;  %s1309_s14 = int_to_ptr.vmem [resolvable:$true] %s520_s14 }
  0x73   : > { %s537_s10 = sshll.u32 %s325_s30, 4  ;;  %s714_s20 = sshll.u32 %s1035_s24, 8  ;;  %s1311_s10 = int_to_ptr.vmem [resolvable:$true] %s537_s10 }
  0x74   : > { %s1318_s7 = scalar_lea.hbm %s1410_s5, %s714_s20  ;;  %s1323_s28 = scalar_lea.hbm %s1411_s6, %s714_s20 }
  0x75   : > { %725 = vmatpush3.bf16.msra.mxu0 %v837_v3  ;;  %733 = vmatpush3.bf16.msra.mxu1 %v838_v4  ;;  %s501_s11 = scalar_lea.sflag [#allocation4], %s1279_s17  ;;  %p1428_p2 = scmp.ne.s32.totalorder %s1424_s12, 0 }
  0x78   : > { %727 = vmatmul.mubr.msk.bf16.vlgmr.msra.gmra.mrb[0].mxu0 %vm352_vm1, %v328_v6  ;;  %735 = vmatmul.mubr.msk.bf16.vlgmr.msra.gmra.mrb[0].mxu1 %vm352_vm1, %v328_v6 }
 0x14b   : > { %v390_v9 = vpop.f32.mrb[0].mxu0  ;;  %v453_v12 = vpop.f32.mrb[0].mxu1 }
 0x14c   : > { %v391_v10 = vadd.f32 %v688_v7, %v390_v9  ;;  %v728_v11 = vpop.f32.mrb[1].mxu0  ;;  %v454_v13 = vadd.f32 %v692_v8, %v453_v12  ;;  %v736_v15 = vpop.f32.mrb[1].mxu1 }
 0x14d   : > { %v393_v14 = vpop.f32.mrb[2].mxu0  ;;  %v456_v18 = vpop.f32.mrb[2].mxu1 }
 0x14e   : > { %v459_v16 = vpack.c.bf16 %v391_v10, %v391_v10  ;;  %v729_v17 = vpop.f32.mrb[3].mxu0  ;;  %v462_v19 = vpack.c.bf16 %v454_v13, %v454_v13  ;;  %v737_v20 = vpop.f32.mrb[3].mxu1 }
 0x150   : > { %461 = vst.msk [vmem:[%s1298_s8] sm:$0xf] %vm460_vm2, %v459_v16  ;;  %480 = vrot.lane.b32.xlu1 %v459_v16, %s1052_s15  ;;  %467 = vrot.lane.b32.xlu0 %v459_v16, %s1053_s19  ;;  %463 = vst.msk [vmem:[%s325_s30] sm:$0xf] %vm460_vm2, %v462_v19 }
 0x154   : > { %485 = vrot.lane.b32.xlu1 %v462_v19, %s1052_s15  ;;  %475 = vrot.lane.b32.xlu0 %v462_v19, %s1053_s19  ;;  %s925_s15 = scalar_lea.vmem %s1309_s14, 256  ;;  %s1055_s19 = smov [#allocation8]  }
 0x155   : > { %p926_p8 = scmp.ne.s32.totalorder %s1309_s14, %s925_s15 }
 0x157   : > { %p927_p1 = pnand %p926_p8, %p1428_p2 }
 0x158   : > { %495 = vrot.lane.b32.xlu1 %v462_v19, %s1054_s18  ;;  %490 = vrot.lane.b32.xlu0 %v459_v16, %s1054_s18  ;;  %s929_s18 = sshll.u32 %s1055_s19, 4  ;;  %s930_s18 = int_to_ptr.vmem [resolvable:$false] %s929_s18 }
 0x159   : > { %p928_p10 = pneg %p927_p1  ;;  %s931_s27 = scalar_lea.vmem %s930_s18, 512 }
 0x15a   : > { %p932_p3 = scmp.lt.s32.totalorder %s1309_s14, %s930_s18  ;;  %p933_p5 = scmp.lt.s32.totalorder %s931_s27, %s925_s15 }
 0x15c   : > { %p934_p9 = por %p933_p5, %p932_p3 }
 0x15e   : > { %p935_p11 = pnand %p934_p9, %p928_p10 }
 0x1c2   : > { %v481_v21 = vpop.permute.xlu1 %480  ;;  %v468_v22 = vpop.permute.xlu0 %467 }
 0x1c3   : > { %700 = vst.msk [vmem:[%s1298_s8 + $0x8] sm:$0xf] %vm460_vm2, %v481_v21  ;;  %697 = vst.msk [vmem:[%s1298_s8 + $0x4] sm:$0xf] %vm460_vm2, %v468_v22 }
 0x1c6   : > { %v486_v23 = vpop.permute.xlu1 %485  ;;  %v476_v24 = vpop.permute.xlu0 %475 }
 0x1c7   : > { %701 = vst.msk [vmem:[%s325_s30 + $0x8] sm:$0xf] %vm460_vm2, %v486_v23  ;;  %699 = vst.msk [vmem:[%s325_s30 + $0x4] sm:$0xf] %vm460_vm2, %v476_v24 }
 0x1ca   : > { %v496_v25 = vpop.permute.xlu1 %495  ;;  %v491_v26 = vpop.permute.xlu0 %490 }
 0x1cb   : > { %703 = vst.msk [vmem:[%s325_s30 + $0xc] sm:$0xf] %vm460_vm2, %v496_v25  ;;  %702 = vst.msk [vmem:[%s1298_s8 + $0xc] sm:$0xf] %vm460_vm2, %v491_v26 }
 0x1cc   : > { %938 = shalt.err (!%p935_p11)
}
 0x1cd   : > { %s939_s8 = scalar_lea.hbm %s1318_s7, 256  ;;  %s943_s29 = scalar_lea.hbm %s1410_s5, 512 }
 0x1ce   : > { %p940_p0 = scmp.ne.s32.totalorder %s1318_s7, %s939_s8  ;;  %p944_p6 = scmp.lt.u32.totalorder %s1318_s7, %s1410_s5 }
 0x1cf   : > { %p945_p7 = scmp.lt.u32.totalorder %s943_s29, %s939_s8  ;;  %p947_p8 = scmp.lt.u32.totalorder %s939_s8, %s1318_s7 }
 0x1d0   : > { %p941_p4 = pnand %p940_p0, %p1428_p2 }
 0x1d1   : > { %p946_p12 = por %p945_p7, %p944_p6 }
 0x1d2   : > { %p942_p13 = pneg %p941_p4 }
 0x1d3   : > { %p948_p1 = por %p947_p8, %p946_p12 }
 0x1d5   : > { %p949_p10 = pnand %p948_p1, %p942_p13 }
 0x1d7   : > { %952 = shalt.err (!%p949_p10)
}
 0x1d8   : > { %s1056_s15 = smov 64   ;;  %s1057_s19 = smov 4  }
 0x1d9   : > { %748 = dma.vmem_to_hbm [thread:$0]  (%p1428_p2), %s1309_s14, 256, %s1318_s7, %s501_s11, %s1056_s15, %s1056_s15, %s1057_s19  }
 0x1da   : > { %s506_s18 = scalar_lea.sflag [#allocation10], %s1279_s17  ;;  %s953_s27 = scalar_lea.vmem %s1311_s10, 256 }
 0x1db   : > { %p954_p3 = scmp.ne.s32.totalorder %s1311_s10, %s953_s27  ;;  %s1058_s8 = smov [#allocation9]  }
 0x1dc   : > { %s957_s30 = sshll.u32 %s1058_s8, 4  ;;  %s958_s30 = int_to_ptr.vmem [resolvable:$false] %s957_s30 }
 0x1dd   : > { %p955_p5 = pnand %p954_p3, %p1428_p2  ;;  %s959_s20 = scalar_lea.vmem %s958_s30, 512 }
 0x1de   : > { %p960_p11 = scmp.lt.s32.totalorder %s1311_s10, %s958_s30  ;;  %p961_p0 = scmp.lt.s32.totalorder %s959_s20, %s953_s27 }
 0x1df   : > { %p956_p9 = pneg %p955_p5 }
 0x1e0   : > { %p962_p4 = por %p961_p0, %p960_p11 }
 0x1e2   : > { %p963_p13 = pnand %p962_p4, %p956_p9 }
 0x1e4   : > { %966 = shalt.err (!%p963_p13)
}
 0x1e5   : > { %s967_s14 = scalar_lea.hbm %s1323_s28, 256  ;;  %s971_s29 = scalar_lea.hbm %s1411_s6, 512 }
 0x1e6   : > { %p968_p6 = scmp.ne.s32.totalorder %s1323_s28, %s967_s14  ;;  %p972_p8 = scmp.lt.u32.totalorder %s1323_s28, %s1411_s6 }
 0x1e7   : > { %p973_p1 = scmp.lt.u32.totalorder %s971_s29, %s967_s14  ;;  %p975_p3 = scmp.lt.u32.totalorder %s967_s14, %s1323_s28 }
 0x1e8   : > { %p969_p7 = pnand %p968_p6, %p1428_p2 }
 0x1e9   : > { %p974_p10 = por %p973_p1, %p972_p8 }
 0x1ea   : > { %p970_p12 = pneg %p969_p7 }
 0x1eb   : > { %p976_p5 = por %p975_p3, %p974_p10 }
 0x1ed   : > { %p977_p9 = pnand %p976_p5, %p970_p12 }
 0x1ef   : > { %980 = shalt.err (!%p977_p9)
}
 0x1f0   : > { %749 = dma.vmem_to_hbm [thread:$0]  (%p1428_p2), %s1311_s10, 256, %s1323_s28, %s506_s18, %s1056_s15, %s1056_s15, %s1057_s19  }
 0x1f1 PF: > { %s1429_s27 = sld [smem:[#allocation15_spill]]  ;;  %s552_s8 = sand.u32 1, %s1023_s21  }
 0x1f2   : > { %p1431_p0 = scmp.ge.s32.totalorder %s1043_s26, 2  ;;  %s553_s30 = scalar_lea.sflag [#allocation4], %s552_s8 }
 0x1f7   : > { %p1430_p11 = scmp.ne.s32.totalorder %s1429_s27, 0 }
 0x1f9   : > { %p764_p4 = pnand %p1431_p0, %p1430_p11 }
 0x1fb   : > { %1014 = dma.done.wait (!%p764_p4), %s553_s30, 256  }
 0x1fc   : > { %1016 = vsyncadd (!%p764_p4), %s553_s30, 4294967040  ;;  %s562_s12 = scalar_lea.sflag [#allocation10], %s552_s8 }
 0x1fd   : > { %1018 = dma.done.wait (!%p764_p4), %s562_s12, 256  }
 0x1fe   : > { %1020 = vsyncadd (!%p764_p4), %s562_s12, 4294967040  ;;  %s27_s26 = sadd.s32 1, %s1043_s26   ;;  %s1432_s21 = smov %s1027_s22 }
 0x1ff   : > { %p24_p13 = scmp.ge.s32.totalorder %s27_s26, 4   ;;  %s1433_s22 = smov %s1031_s23 }
 0x200   : > { %s1434_s23 = smov %s1236_s13  ;;  %s1435_s24 = smov %s1039_s25 }
 0x201   : > { %s1436_s25 = smov %s1438_s16  ;;  %26 = sbr.rel (!%p24_p13) target bundleno = 9 (0x9), region = 116 }
 0x208   :  { %567 = vsyncpa [#allocation3], 1 }
 0x209   :  { %569 = vsyncpa [#allocation3 + $0x1], 1 }
 0x20a   :  { %570 = vsyncpa [#allocation6], 1 }
 0x20b   :  { %571 = vsyncpa [#allocation4], 1 }
 0x20c   :  { %573 = vsyncpa [#allocation4 + $0x1], 1 }
 0x20d   :  { %574 = vsyncpa [#allocation10], 1 }
 0x20e   :  { %576 = vsyncpa [#allocation10 + $0x1], 1 }

// kernel: tpu_custom_call.1
= control target key start
LH: loop header
LB: loop body
LE: loop exit
PB: predicated region body
PF: predicated region fallthrough
CT: control target
= control target key end

     0   :  { %12 = vsyncpa [#allocation3], 0  ;;  %s1405_s0 = inlined_call_operand.hbm [shape: f32[2,8,32], index: 0, kind: input, shape index: {}]   ;;  %s1406_s1 = inlined_call_operand.hbm [shape: bf16[32,32], index: 1, kind: input, shape index: {}]   ;;  %s1407_s2 = inlined_call_operand.vmem [shape: f32[1,32], index: 2, kind: input, shape index: {}]   ;;  %s1408_s3 = inlined_call_operand.hbm [shape: bf16[32,32], index: 3, kind: input, shape index: {}]   ;;  %s1409_s4 = inlined_call_operand.vmem [shape: f32[1,32], index: 4, kind: input, shape index: {}]   ;;  %s1410_s5 = inlined_call_operand.hbm [shape: bf16[2,4,8,8], index: 5, kind: output, shape index: {0}]   ;;  %s1411_s6 = inlined_call_operand.hbm [shape: bf16[2,4,8,8], index: 6, kind: output, shape index: {1}]  }
   0x1   :  { %14 = vsyncpa [#allocation3 + $0x1], 0 }
   0x2   :  { %15 = vsyncpa [#allocation6], 0 }
   0x3   :  { %16 = vsyncpa [#allocation4], 0 }
   0x4   :  { %18 = vsyncpa [#allocation4 + $0x1], 0 }
   0x5   :  { %19 = vsyncpa [#allocation10], 0 }
   0x6   :  { %21 = vsyncpa [#allocation10 + $0x1], 0  ;;  %s1094_s21 = smov 0   ;;  %s1096_s22 = smov 0  }
   0x7   :  { %s1098_s23 = smov 0   ;;  %s1100_s24 = smov 0  }
   0x8   :  { %s1102_s25 = smov 0   ;;  %s1104_s26 = smov 0  }
   0x9 LB: > { %s674_s27 = sadd.s32 4294967295, %s1043_s26   ;;  %s675_s28 = sadd.s32 4294967294, %s1043_s26   ;;  %s1043_s26 = sphi %s1104_s26, %s27_s26   ;;  %s1039_s25 = sphi %s1102_s25, %s1436_s25   ;;  %s1035_s24 = sphi %s1100_s24, %s1435_s24   ;;  %s1031_s23 = sphi %s1098_s23, %s1434_s23   ;;  %s1027_s22 = sphi %s1096_s22, %s1433_s22   ;;  %s1023_s21 = sphi %s1094_s21, %s1432_s21  }
   0xa   : > { %p61_p0 = scmp.ne.s32.totalorder %s1027_s22, %s1023_s21  ;;  %p1128_p1 = scmp.eq.s32.totalorder %s674_s27, 0 }
   0xb   : > { %p1132_p2 = scmp.eq.s32.totalorder %s674_s27, 1  ;;  %p177_p3 = scmp.eq.s32.totalorder %s675_s28, 1 }
   0xc   : > { %s1417_s29 = scalar_select %p1128_p1, 1, 0 }
   0xd   : > { %p1138_p4 = por %p1128_p1, %p61_p0  ;;  %p676_p5 = scmp.ge.s32.totalorder %s1043_s26, 1 }
   0xe   : > { %p1143_p6 = por %p177_p3, %p61_p0  ;;  %p212_p7 = scmp.lt.s32.totalorder %s1043_s26, 3 }
   0xf   : > { %s1419_s7 = scalar_select %p1138_p4, 1, 0 }
  0x10   : > { %s1420_s8 = scalar_select %p1143_p6, 1, 0 }
  0x11   : > { %p1148_p8 = pnand %p676_p5, %p212_p7  ;;  %s1045_s10 = smov [#allocation5]  }
  0x12   : > { %1421 = sst [smem:[#allocation15_spill]] %s1420_s8  ;;  %s224_s11 = sshll.u32 %s1045_s10, 4  ;;  %s1152_s11 = int_to_ptr.vmem [resolvable:$true] %s224_s11 }
  0x13   : > { %p752_p9 = pneg %p1148_p8  ;;  %s1046_s13 = smov [#allocation7]  }
  0x14   : > { %s240_s14 = sshll.u32 %s1046_s13, 4  ;;  %s839_s17 = scalar_lea.hbm %s1406_s1, 256  ;;  %s1163_s14 = int_to_ptr.vmem [resolvable:$true] %s240_s14 }
  0x15   : > { %p1159_p11 = pnand %p752_p9, %p1128_p1  ;;  %p840_p12 = scmp.ne.s32.totalorder %s1406_s1, %s839_s17 }
  0x16   : > { %p846_p5 = scmp.lt.u32.totalorder %s839_s17, %s1406_s1 }
  0x17   : > { %p841_p13 = pneg %p1159_p11 }
  0x19   : > { %p842_p0 = pnand %p841_p13, %p840_p12 }
  0x1b   : > { %p843_p3 = pneg %p842_p0 }
  0x1d   : > { %p848_p7 = pnand %p846_p5, %p843_p3 }
  0x1f   : > { %851 = shalt.err (!%p848_p7)
}
  0x20   : > { %s852_s28 = scalar_lea.vmem %s1152_s11, 256  ;;  %p860_p1 = scmp.lt.s32.totalorder %s1152_s11, %s1152_s11 }
  0x21   : > { %p853_p9 = scmp.ne.s32.totalorder %s1152_s11, %s852_s28  ;;  %p861_p12 = scmp.lt.s32.totalorder %s852_s28, %s852_s28 }
  0x23   : > { %p855_p10 = pnand %p853_p9, %p841_p13  ;;  %p862_p0 = por %p861_p12, %p860_p1 }
  0x25   : > { %p856_p6 = pneg %p855_p10 }
  0x27   : > { %p863_p4 = pnand %p862_p0, %p856_p6 }
  0x29   : > { %866 = shalt.err (!%p863_p4)
}
  0x2a   : > { %s1047_s10 = smov 64   ;;  %s1048_s13 = smov 4  }
  0x2b   : > { %755 = dma.hbm_to_vmem [thread:$0]  (!%p1159_p11), %s1406_s1, 256, %s1152_s11, [#allocation6], %s1047_s10, %s1047_s10, %s1048_s13  }
  0x2c   : > { %s867_s19 = scalar_lea.hbm %s1408_s3, 256 }
  0x2d   : > { %p868_p1 = scmp.ne.s32.totalorder %s1408_s3, %s867_s19  ;;  %p874_p10 = scmp.lt.u32.totalorder %s867_s19, %s1408_s3 }
  0x2f   : > { %p870_p4 = pnand %p868_p1, %p841_p13 }
  0x31   : > { %p871_p6 = pneg %p870_p4 }
  0x33   : > { %p876_p3 = pnand %p874_p10, %p871_p6 }
  0x35   : > { %879 = shalt.err (!%p876_p3)
}
  0x36   : > { %s880_s11 = scalar_lea.vmem %s1163_s14, 256  ;;  %p888_p12 = scmp.lt.s32.totalorder %s1163_s14, %s1163_s14 }
  0x37   : > { %p881_p5 = scmp.ne.s32.totalorder %s1163_s14, %s880_s11  ;;  %p889_p0 = scmp.lt.s32.totalorder %s880_s11, %s880_s11 }
  0x39   : > { %p883_p7 = pnand %p881_p5, %p841_p13  ;;  %p890_p1 = por %p889_p0, %p888_p12 }
  0x3b   : > { %p884_p9 = pneg %p883_p7 }
  0x3d   : > { %p891_p4 = pnand %p890_p1, %p884_p9 }
  0x3f   : > { %894 = shalt.err (!%p891_p4)
}
  0x40   : > { %758 = dma.hbm_to_vmem [thread:$0]  (!%p1159_p11), %s1408_s3, 256, %s1163_s14, [#allocation6], %s1047_s10, %s1047_s10, %s1048_s13  }
  0x41   : > { %s39_s16 = sadd.s32 1, %s1039_s25  ;;  %s48_s17 = sadd.s32 1, %s1031_s23 }
  0x42   : > { %p41_p13 = scmp.ge.s32.totalorder %s39_s16, 2  ;;  %p55_p6 = scmp.ne.s32.totalorder %s1031_s23, %s1027_s22 }
  0x43   : > { %p56_p10 = scmp.eq.s32.totalorder %s1043_s26, 0  ;;  %p772_p3 = scmp.lt.s32.totalorder %s1043_s26, 2 }
  0x44   : > { %s1438_s16 = smov (%p41_p13, %s39_s16), 0  ;;  %p1227_p7 = por %p1132_p2, %p55_p6 }
  0x45   : > { %p57_p5 = por %p56_p10, %p55_p6  ;;  %s43_s18 = ssub.s32 %s1039_s25, %s1438_s16 }
  0x46   : > { %s1424_s12 = scalar_select %p1227_p7, 1, 0 }
  0x47   : > { %s257_s19 = sand.u32 1, %s1031_s23   ;;  %p46_p9 = scmp.eq.s32.totalorder %s43_s18, 0 }
  0x48   : > { %s680_s14 = sshll.u32 %s257_s19, 3  ;;  %s681_s10 = sshll.u32 %s1039_s25, 7 }
  0x49   : > { %s1236_s13 = scalar_select %p46_p9, %s1031_s23, %s48_s17  }
  0x4a   : > { %s1241_s28 = scalar_lea.hbm %s1405_s0, %s681_s10  ;;  %s261_s30 = scalar_lea.vmem [#allocation2], %s680_s14 }
  0x4b   : > { %s269_s11 = sshll.u32 %s261_s30, 4  ;;  %p1245_p2 = pnand %p772_p3, %p57_p5  ;;  %s1249_s11 = int_to_ptr.vmem [resolvable:$true] %s269_s11 }
  0x4c   : > { %s258_s15 = scalar_lea.sflag [#allocation3], %s257_s19  ;;  %s895_s17 = scalar_lea.hbm %s1241_s28, 128 }
  0x4d   : > { %p896_p11 = scmp.ne.s32.totalorder %s1241_s28, %s895_s17  ;;  %p897_p12 = pneg %p1245_p2 }
  0x4e   : > { %s900_s10 = scalar_lea.hbm %s1405_s0, 256  ;;  %p901_p4 = scmp.lt.u32.totalorder %s1241_s28, %s1405_s0 }
  0x4f   : > { %p898_p0 = pnand %p897_p12, %p896_p11  ;;  %p902_p13 = scmp.lt.u32.totalorder %s900_s10, %s895_s17 }
  0x50   : > { %p904_p10 = scmp.lt.u32.totalorder %s895_s17, %s1241_s28 }
  0x51   : > { %p899_p1 = pneg %p898_p0  ;;  %p903_p6 = por %p902_p13, %p901_p4 }
  0x53   : > { %p905_p3 = por %p904_p10, %p903_p6 }
  0x55   : > { %p906_p5 = pnand %p905_p3, %p899_p1 }
  0x57   : > { %909 = shalt.err (!%p906_p5)
}
  0x58   : > { %s910_s19 = scalar_lea.vmem %s1249_s11, 128  ;;  %s1049_s30 = smov [#allocation2]  }
  0x59   : > { %p911_p9 = scmp.ne.s32.totalorder %s1249_s11, %s910_s19  ;;  %s915_s18 = sshll.u32 %s1049_s30, 4  ;;  %s916_s18 = int_to_ptr.vmem [resolvable:$false] %s915_s18 }
  0x5a   : > { %s917_s14 = scalar_lea.vmem %s916_s18, 256  ;;  %p918_p7 = scmp.lt.s32.totalorder %s1249_s11, %s916_s18 }
  0x5b   : > { %p913_p11 = pnand %p911_p9, %p897_p12  ;;  %p919_p4 = scmp.lt.s32.totalorder %s917_s14, %s910_s19 }
  0x5d   : > { %p914_p0 = pneg %p913_p11  ;;  %p920_p13 = por %p919_p4, %p918_p7 }
  0x5f   : > { %p921_p6 = pnand %p920_p13, %p914_p0 }
  0x61   : > { %924 = shalt.err (!%p921_p6)
}
  0x62   : > { %762 = dma.hbm_to_vmem [thread:$0]  (!%p1245_p2), %s1241_s28, 128, %s1249_s11, %s258_s15  }
  0x63   : > { %278 = sbr.rel (%p1148_p8) target bundleno = 497 (0x1f1), region = 40  ;;  %s1279_s17 = sand.u32 (!%p1148_p8), 1, %s1027_s22  }
  0x64   : > { %s683_s10 = sshll.u32 (!%p1148_p8), %s1279_s17, 3  ;;  %s281_s20 = scalar_lea.sflag (!%p1148_p8), [#allocation3], %s1279_s17 }
  0x65   : > { %s284_s27 = scalar_lea.vmem (!%p1148_p8), [#allocation2], %s683_s10  ;;  %p1426_p7 = scmp.ne.s32.totalorder (!%p1148_p8), %s1419_s7, 0 }
  0x6a   : > { %1006 = dma.done.wait (%p1426_p7), %s281_s20, 128  }
  0x6b   : > { %1008 = vsyncadd (%p1426_p7), %s281_s20, 4294967168  ;;  %p1427_p12 = scmp.ne.s32.totalorder %s1417_s29, 0 }
  0x6d   : > { %1010 = dma.done.wait (%p1427_p12), [#allocation6], 512  }
  0x6e   : > { %1012 = vsyncadd (%p1427_p12), [#allocation6], 4294966784  ;;  %v1050_v0 = vmov 0.0   ;;  %vm1051_vm0 = vmmov 0   ;;  %v835_v1 = vld [vmem:[#allocation5] sm:$0xff]   ;;  %v836_v2 = vld [vmem:[#allocation7] sm:$0xff]  }
  0x6f   : > { %722 = vmatprep.subr.bf16.mxu0 %v1050_v0  ;;  %730 = vmatprep.subr.bf16.mxu1 %v1050_v0  ;;  %v837_v3 = vld [vmem:[#allocation5 + $0x8] sm:$0xff]   ;;  %v838_v4 = vld [vmem:[#allocation7 + $0x8] sm:$0xff]   ;;  %vm352_vm1 = vcmask 261120   ;;  %s686_s29 = sshll.u32 %s1279_s17, 4  ;;  %v688_v7 = vld [vmem:[%s1407_s2] ss:$0 sm:$0xff] }
  0x70   : > { %726 = vmatprep.mubr.msk.bf16.mxu0 %vm1051_vm0, %v1050_v0  ;;  %734 = vmatprep.mubr.msk.bf16.mxu1 %vm1051_vm0, %v1050_v0  ;;  %v327_v5 = vld [vmem:[%s284_s27] sm:$0xff]  ;;  %vm460_vm2 = vcmask 60416   ;;  %s1298_s8 = scalar_lea.vmem [#allocation8], %s686_s29  ;;  %s1052_s15 = smov 112  }
  0x71   : > { %723 = vmatpush3.bf16.msra.mxu0 %v835_v1  ;;  %731 = vmatpush3.bf16.msra.mxu1 %v836_v2  ;;  %v328_v6 = vpack.c.bf16 %v327_v5, %v327_v5  ;;  %v692_v8 = vld [vmem:[%s1409_s4] ss:$0 sm:$0xff]  ;;  %s1053_s19 = smov 120   ;;  %s325_s30 = scalar_lea.vmem [#allocation9], %s686_s29 }
  0x72   : > { %724 = vmatprep.subr.bf16.mxu0 %v1050_v0  ;;  %732 = vmatprep.subr.bf16.mxu1 %v1050_v0  ;;  %s1054_s18 = smov 104   ;;  %s520_s14 = sshll.u32 %s1298_s8, 4  ;;  %s1309_s14 = int_to_ptr.vmem [resolvable:$true] %s520_s14 }
  0x73   : > { %s537_s10 = sshll.u32 %s325_s30, 4  ;;  %s714_s20 = sshll.u32 %s1035_s24, 8  ;;  %s1311_s10 = int_to_ptr.vmem [resolvable:$true] %s537_s10 }
  0x74   : > { %s1318_s7 = scalar_lea.hbm %s1410_s5, %s714_s20  ;;  %s1323_s28 = scalar_lea.hbm %s1411_s6, %s714_s20 }
  0x75   : > { %725 = vmatpush3.bf16.msra.mxu0 %v837_v3  ;;  %733 = vmatpush3.bf16.msra.mxu1 %v838_v4  ;;  %s501_s11 = scalar_lea.sflag [#allocation4], %s1279_s17  ;;  %p1428_p2 = scmp.ne.s32.totalorder %s1424_s12, 0 }
  0x78   : > { %727 = vmatmul.mubr.msk.bf16.vlgmr.msra.gmra.mrb[0].mxu0 %vm352_vm1, %v328_v6  ;;  %735 = vmatmul.mubr.msk.bf16.vlgmr.msra.gmra.mrb[0].mxu1 %vm352_vm1, %v328_v6 }
 0x14b   : > { %v390_v9 = vpop.f32.mrb[0].mxu0  ;;  %v453_v12 = vpop.f32.mrb[0].mxu1 }
 0x14c   : > { %v391_v10 = vadd.f32 %v688_v7, %v390_v9  ;;  %v728_v11 = vpop.f32.mrb[1].mxu0  ;;  %v454_v13 = vadd.f32 %v692_v8, %v453_v12  ;;  %v736_v15 = vpop.f32.mrb[1].mxu1 }
 0x14d   : > { %v393_v14 = vpop.f32.mrb[2].mxu0  ;;  %v456_v18 = vpop.f32.mrb[2].mxu1 }
 0x14e   : > { %v459_v16 = vpack.c.bf16 %v391_v10, %v391_v10  ;;  %v729_v17 = vpop.f32.mrb[3].mxu0  ;;  %v462_v19 = vpack.c.bf16 %v454_v13, %v454_v13  ;;  %v737_v20 = vpop.f32.mrb[3].mxu1 }
 0x150   : > { %461 = vst.msk [vmem:[%s1298_s8] sm:$0xf] %vm460_vm2, %v459_v16  ;;  %480 = vrot.lane.b32.xlu1 %v459_v16, %s1052_s15  ;;  %467 = vrot.lane.b32.xlu0 %v459_v16, %s1053_s19  ;;  %463 = vst.msk [vmem:[%s325_s30] sm:$0xf] %vm460_vm2, %v462_v19 }
 0x154   : > { %485 = vrot.lane.b32.xlu1 %v462_v19, %s1052_s15  ;;  %475 = vrot.lane.b32.xlu0 %v462_v19, %s1053_s19  ;;  %s925_s15 = scalar_lea.vmem %s1309_s14, 256  ;;  %s1055_s19 = smov [#allocation8]  }
 0x155   : > { %p926_p8 = scmp.ne.s32.totalorder %s1309_s14, %s925_s15 }
 0x157   : > { %p927_p1 = pnand %p926_p8, %p1428_p2 }
 0x158   : > { %495 = vrot.lane.b32.xlu1 %v462_v19, %s1054_s18  ;;  %490 = vrot.lane.b32.xlu0 %v459_v16, %s1054_s18  ;;  %s929_s18 = sshll.u32 %s1055_s19, 4  ;;  %s930_s18 = int_to_ptr.vmem [resolvable:$false] %s929_s18 }
 0x159   : > { %p928_p10 = pneg %p927_p1  ;;  %s931_s27 = scalar_lea.vmem %s930_s18, 512 }
 0x15a   : > { %p932_p3 = scmp.lt.s32.totalorder %s1309_s14, %s930_s18  ;;  %p933_p5 = scmp.lt.s32.totalorder %s931_s27, %s925_s15 }
 0x15c   : > { %p934_p9 = por %p933_p5, %p932_p3 }
 0x15e   : > { %p935_p11 = pnand %p934_p9, %p928_p10 }
 0x1c2   : > { %v481_v21 = vpop.permute.xlu1 %480  ;;  %v468_v22 = vpop.permute.xlu0 %467 }
 0x1c3   : > { %700 = vst.msk [vmem:[%s1298_s8 + $0x8] sm:$0xf] %vm460_vm2, %v481_v21  ;;  %697 = vst.msk [vmem:[%s1298_s8 + $0x4] sm:$0xf] %vm460_vm2, %v468_v22 }
 0x1c6   : > { %v486_v23 = vpop.permute.xlu1 %485  ;;  %v476_v24 = vpop.permute.xlu0 %475 }
 0x1c7   : > { %701 = vst.msk [vmem:[%s325_s30 + $0x8] sm:$0xf] %vm460_vm2, %v486_v23  ;;  %699 = vst.msk [vmem:[%s325_s30 + $0x4] sm:$0xf] %vm460_vm2, %v476_v24 }
 0x1ca   : > { %v496_v25 = vpop.permute.xlu1 %495  ;;  %v491_v26 = vpop.permute.xlu0 %490 }
 0x1cb   : > { %703 = vst.msk [vmem:[%s325_s30 + $0xc] sm:$0xf] %vm460_vm2, %v496_v25  ;;  %702 = vst.msk [vmem:[%s1298_s8 + $0xc] sm:$0xf] %vm460_vm2, %v491_v26 }
 0x1cc   : > { %938 = shalt.err (!%p935_p11)
}
 0x1cd   : > { %s939_s8 = scalar_lea.hbm %s1318_s7, 256  ;;  %s943_s29 = scalar_lea.hbm %s1410_s5, 512 }
 0x1ce   : > { %p940_p0 = scmp.ne.s32.totalorder %s1318_s7, %s939_s8  ;;  %p944_p6 = scmp.lt.u32.totalorder %s1318_s7, %s1410_s5 }
 0x1cf   : > { %p945_p7 = scmp.lt.u32.totalorder %s943_s29, %s939_s8  ;;  %p947_p8 = scmp.lt.u32.totalorder %s939_s8, %s1318_s7 }
 0x1d0   : > { %p941_p4 = pnand %p940_p0, %p1428_p2 }
 0x1d1   : > { %p946_p12 = por %p945_p7, %p944_p6 }
 0x1d2   : > { %p942_p13 = pneg %p941_p4 }
 0x1d3   : > { %p948_p1 = por %p947_p8, %p946_p12 }
 0x1d5   : > { %p949_p10 = pnand %p948_p1, %p942_p13 }
 0x1d7   : > { %952 = shalt.err (!%p949_p10)
}
 0x1d8   : > { %s1056_s15 = smov 64   ;;  %s1057_s19 = smov 4  }
 0x1d9   : > { %748 = dma.vmem_to_hbm [thread:$0]  (%p1428_p2), %s1309_s14, 256, %s1318_s7, %s501_s11, %s1056_s15, %s1056_s15, %s1057_s19  }
 0x1da   : > { %s506_s18 = scalar_lea.sflag [#allocation10], %s1279_s17  ;;  %s953_s27 = scalar_lea.vmem %s1311_s10, 256 }
 0x1db   : > { %p954_p3 = scmp.ne.s32.totalorder %s1311_s10, %s953_s27  ;;  %s1058_s8 = smov [#allocation9]  }
 0x1dc   : > { %s957_s30 = sshll.u32 %s1058_s8, 4  ;;  %s958_s30 = int_to_ptr.vmem [resolvable:$false] %s957_s30 }
 0x1dd   : > { %p955_p5 = pnand %p954_p3, %p1428_p2  ;;  %s959_s20 = scalar_lea.vmem %s958_s30, 512 }
 0x1de   : > { %p960_p11 = scmp.lt.s32.totalorder %s1311_s10, %s958_s30  ;;  %p961_p0 = scmp.lt.s32.totalorder %s959_s20, %s953_s27 }
 0x1df   : > { %p956_p9 = pneg %p955_p5 }
 0x1e0   : > { %p962_p4 = por %p961_p0, %p960_p11 }
 0x1e2   : > { %p963_p13 = pnand %p962_p4, %p956_p9 }
 0x1e4   : > { %966 = shalt.err (!%p963_p13)
}
 0x1e5   : > { %s967_s14 = scalar_lea.hbm %s1323_s28, 256  ;;  %s971_s29 = scalar_lea.hbm %s1411_s6, 512 }
 0x1e6   : > { %p968_p6 = scmp.ne.s32.totalorder %s1323_s28, %s967_s14  ;;  %p972_p8 = scmp.lt.u32.totalorder %s1323_s28, %s1411_s6 }
 0x1e7   : > { %p973_p1 = scmp.lt.u32.totalorder %s971_s29, %s967_s14  ;;  %p975_p3 = scmp.lt.u32.totalorder %s967_s14, %s1323_s28 }
 0x1e8   : > { %p969_p7 = pnand %p968_p6, %p1428_p2 }
 0x1e9   : > { %p974_p10 = por %p973_p1, %p972_p8 }
 0x1ea   : > { %p970_p12 = pneg %p969_p7 }
 0x1eb   : > { %p976_p5 = por %p975_p3, %p974_p10 }
 0x1ed   : > { %p977_p9 = pnand %p976_p5, %p970_p12 }
 0x1ef   : > { %980 = shalt.err (!%p977_p9)
}
 0x1f0   : > { %749 = dma.vmem_to_hbm [thread:$0]  (%p1428_p2), %s1311_s10, 256, %s1323_s28, %s506_s18, %s1056_s15, %s1056_s15, %s1057_s19  }
 0x1f1 PF: > { %s1429_s27 = sld [smem:[#allocation15_spill]]  ;;  %s552_s8 = sand.u32 1, %s1023_s21  }
 0x1f2   : > { %p1431_p0 = scmp.ge.s32.totalorder %s1043_s26, 2  ;;  %s553_s30 = scalar_lea.sflag [#allocation4], %s552_s8 }
 0x1f7   : > { %p1430_p11 = scmp.ne.s32.totalorder %s1429_s27, 0 }
 0x1f9   : > { %p764_p4 = pnand %p1431_p0, %p1430_p11 }
 0x1fb   : > { %1014 = dma.done.wait (!%p764_p4), %s553_s30, 256  }
 0x1fc   : > { %1016 = vsyncadd (!%p764_p4), %s553_s30, 4294967040  ;;  %s562_s12 = scalar_lea.sflag [#allocation10], %s552_s8 }
 0x1fd   : > { %1018 = dma.done.wait (!%p764_p4), %s562_s12, 256  }
 0x1fe   : > { %1020 = vsyncadd (!%p764_p4), %s562_s12, 4294967040  ;;  %s27_s26 = sadd.s32 1, %s1043_s26   ;;  %s1432_s21 = smov %s1027_s22 }
 0x1ff   : > { %p24_p13 = scmp.ge.s32.totalorder %s27_s26, 4   ;;  %s1433_s22 = smov %s1031_s23 }
 0x200   : > { %s1434_s23 = smov %s1236_s13  ;;  %s1435_s24 = smov %s1039_s25 }
 0x201   : > { %s1436_s25 = smov %s1438_s16  ;;  %26 = sbr.rel (!%p24_p13) target bundleno = 9 (0x9), region = 116 }
 0x208   :  { %567 = vsyncpa [#allocation3], 1 }
 0x209   :  { %569 = vsyncpa [#allocation3 + $0x1], 1 }
 0x20a   :  { %570 = vsyncpa [#allocation6], 1 }
 0x20b   :  { %571 = vsyncpa [#allocation4], 1 }
 0x20c   :  { %573 = vsyncpa [#allocation4 + $0x1], 1 }
 0x20d   :  { %574 = vsyncpa [#allocation10], 1 }
 0x20e   :  { %576 = vsyncpa [#allocation10 + $0x1], 1 }

</bundles_post_ra>
